<compile_context>
chip_gen: v7x
topology: tpu7x:2x2x1
jax: 0.10.0
libtpu: 0.0.40
codegen_flags: <defaults>
</compile_context>

<pallas_src>
import functools

import jax
import jax.numpy as jnp
from jax import lax
from jax.experimental import pallas as pl
from jax.experimental.pallas import tpu as pltpu

HIDDEN = 200


def _round_up(x, m):
    return ((x + m - 1) // m) * m


def _softplus(z):
    # numerically stable softplus
    return jnp.maximum(z, 0.0) + jnp.log1p(jnp.exp(-jnp.abs(z)))


def _mlp_kernel(x_ref,
                w0_ref, b0_ref, w1_ref, b1_ref, w2_ref, b2_ref,
                w3_ref, b3_ref, maxlv_ref, minlv_ref,
                out_ref, *, k_out, compute_dtype, approx_recip):
    """One (ensemble, batch-tile) step of the dynamics-model MLP.

    Layer 0 uses an f32 weight (it carries the folded 1/sigma input scale and
    has a tiny contraction dim); layers 1-3 use `compute_dtype` MXU operands
    with f32 accumulation.  The final layer is a single fused lane-dense dot:
    lanes [0, K) are the mean, lanes [K, 2K) the log-variance; the softplus
    bounds + exp run on all lanes (bounded, no overflow) and a lane select
    keeps the mean lanes untouched.  One (TB, O_pad) tile is written.
    """

    def swish(h):
        if approx_recip:
            return h * pl.reciprocal(1.0 + jnp.exp(-h), approx=True)
        return h * jax.nn.sigmoid(h)

    x = x_ref[0].astype(jnp.float32)                                    # (TB, F)

    h = jnp.dot(x, w0_ref[0], preferred_element_type=jnp.float32) + b0_ref[0]
    h = swish(h).astype(compute_dtype)
    h = jnp.dot(h, w1_ref[0], preferred_element_type=jnp.float32) + b1_ref[0]
    h = swish(h).astype(compute_dtype)
    h = jnp.dot(h, w2_ref[0], preferred_element_type=jnp.float32) + b2_ref[0]
    h = swish(h).astype(compute_dtype)

    # Fused final layer: mean lanes [0, K), logvar lanes [K, 2K), rest padding.
    out = jnp.dot(h, w3_ref[0], preferred_element_type=jnp.float32) + b3_ref[0]

    maxlv = maxlv_ref[...]                  # (1, O_pad): zeros except lanes [K, 2K)
    minlv = minlv_ref[...]
    lv = maxlv - _softplus(maxlv - out)
    lv = minlv + _softplus(lv - minlv)
    var = jnp.exp(lv)                       # bounded (<= 2) on non-logvar lanes

    lane = lax.broadcasted_iota(jnp.int32, out.shape, dimension=1)
    is_logvar = jnp.logical_and(lane >= k_out, lane < 2 * k_out)
    out_ref[0] = jnp.where(is_logvar, var, out)


def prepare_params(params, *, compute_dtype=jnp.bfloat16):
    """Fold input normalization into layer 0, pad to lane-dense shapes, cast.

    Call once per parameter set (weights are static across rollout steps) and
    reuse the result across `pt_model_forward_prepared` calls.
    """
    (mu, sigma, w0, b0, w1, b1, w2, b2, w3, b3, max_logvar, min_logvar) = params
    E, F, H = w0.shape
    O = w3.shape[-1]
    K = max_logvar.shape[-1]
    if O != 2 * K:
        raise ValueError(f"out_features ({O}) must equal 2 * logvar width ({K})")

    # Replicate fit_input_stats clamp: sigma < 1e-12 -> 1.0.
    sigma_safe = jnp.where(sigma < 1e-12, 1.0, sigma)
    inv_sigma = 1.0 / sigma_safe

    # Fold (x - mu) / sigma into layer 0:
    #   x @ (w0 * inv_sigma) + (b0 - (mu * inv_sigma) @ w0)
    # The folded weight stays f32 (carries the 1/sigma scale; tiny matmul).
    w0f = (w0 * inv_sigma[0][None, :, None]).astype(jnp.float32)
    b0f = (b0 - jnp.einsum('f,efh->eh', (mu * inv_sigma)[0], w0)[:, None, :])

    H_pad = _round_up(H, 128)        # 200 -> 256
    O_pad = _round_up(O, 128)        # fused mean|logvar output width (>= 128)

    def pad_to(a, shape):
        return jnp.pad(a, [(0, s - d) for d, s in zip(a.shape, shape)])

    maxp = jnp.zeros((1, O_pad), jnp.float32).at[:, K:2 * K].set(max_logvar)
    minp = jnp.zeros((1, O_pad), jnp.float32).at[:, K:2 * K].set(min_logvar)

    return dict(
        w0=pad_to(w0f, (E, F, H_pad)),                              # f32, width F
        b0=pad_to(b0f, (E, 1, H_pad)).astype(jnp.float32),
        w1=pad_to(w1, (E, H_pad, H_pad)).astype(compute_dtype),
        b1=pad_to(b1, (E, 1, H_pad)).astype(jnp.float32),
        w2=pad_to(w2, (E, H_pad, H_pad)).astype(compute_dtype),
        b2=pad_to(b2, (E, 1, H_pad)).astype(jnp.float32),
        w3=pad_to(w3, (E, H_pad, O_pad)).astype(compute_dtype),    # mean|logvar fused
        b3=pad_to(b3, (E, 1, O_pad)).astype(jnp.float32),
        maxlv=maxp,
        minlv=minp,
        k_out=K,
        compute_dtype=compute_dtype,
    )


def pt_model_forward_prepared(x, prep, *, batch_tile=2048):
    """x: (E, B, in_features) f32 -> (mean, var), each (E, B, out_features//2)."""
    E, B, F = x.shape
    compute_dtype = prep["compute_dtype"]
    K = prep["k_out"]
    H_pad = prep["w1"].shape[-1]
    O_pad = prep["w3"].shape[-1]
    if prep["w0"].shape != (E, F, H_pad):
        raise ValueError("prepared params do not match input shape")

    # Large batch tile amortizes per-grid-step overhead; cap so B_pad waste is
    # bounded for small batches.
    TB = _round_up(min(batch_tile, _round_up(B, 8)), 8)
    B_pad = _round_up(B, TB)

    xp = x
    if B_pad != B:
        xp = jnp.pad(x, ((0, 0), (0, B_pad - B), (0, 0)))
    xp = xp.astype(compute_dtype)          # halves the x DMA in bf16 mode

    # Ensemble OUTER, batch-tile INNER: weight blocks keep the same index
    # across the inner axis -> stay VMEM-resident (no re-DMA per batch tile).
    grid = (E, B_pad // TB)
    ens_w = lambda e, b: (e, 0, 0)         # per-ensemble weights / biases
    ens_xb = lambda e, b: (e, b, 0)        # activations / output
    shared = lambda e, b: (0, 0)           # shared logvar bounds

    kernel = functools.partial(
        _mlp_kernel, k_out=K, compute_dtype=compute_dtype,
        approx_recip=(compute_dtype != jnp.float32))

    out = pl.pallas_call(
        kernel,
        out_shape=jax.ShapeDtypeStruct((E, B_pad, O_pad), jnp.float32),
        grid=grid,
        in_specs=[
            pl.BlockSpec((1, TB, F), ens_xb),        # x, true feature width
            pl.BlockSpec((1, F, H_pad), ens_w),      # lin0_w (folded 1/sigma, f32)
            pl.BlockSpec((1, 1, H_pad), ens_w),      # lin0_b (folded)
            pl.BlockSpec((1, H_pad, H_pad), ens_w),  # lin1_w
            pl.BlockSpec((1, 1, H_pad), ens_w),      # lin1_b
            pl.BlockSpec((1, H_pad, H_pad), ens_w),  # lin2_w
            pl.BlockSpec((1, 1, H_pad), ens_w),      # lin2_b
            pl.BlockSpec((1, H_pad, O_pad), ens_w),  # lin3_w (mean | logvar fused)
            pl.BlockSpec((1, 1, O_pad), ens_w),      # lin3_b
            pl.BlockSpec((1, O_pad), shared),        # max_logvar (lanes [K, 2K))
            pl.BlockSpec((1, O_pad), shared),        # min_logvar (lanes [K, 2K))
        ],
        out_specs=pl.BlockSpec((1, TB, O_pad), ens_xb),  # single lane-dense output
        compiler_params=pltpu.CompilerParams(
            dimension_semantics=("parallel", "parallel")),
    )(xp, prep["w0"], prep["b0"], prep["w1"], prep["b1"], prep["w2"],
      prep["b2"], prep["w3"], prep["b3"], prep["maxlv"], prep["minlv"])

    # Strip batch/lane padding in the wrapper (layout plumbing, not compute).
    mean = out[:, :B, :K]
    var = out[:, :B, K:2 * K]
    return mean, var


def pt_model_forward(x, params, *, compute_dtype=jnp.bfloat16, batch_tile=2048):
    prep = prepare_params(params, compute_dtype=compute_dtype)
    return pt_model_forward_prepared(x, prep, batch_tile=batch_tile)


def init_params(key, ensemble_size, in_features, out_features):
    """Deterministic synthetic init matching get_affine_params shapes:
       w ~ N(0, 1/(2*sqrt(fan_in))), b = 0."""
    def affine(k, e, fin, fout):
        std = 1.0 / (2.0 * jnp.sqrt(jnp.float32(fin)))
        w = jax.random.normal(k, (e, fin, fout), dtype=jnp.float32) * std
        b = jnp.zeros((e, 1, fout), dtype=jnp.float32)
        return w, b

    k0, k1, k2, k3, k4 = jax.random.split(key, 5)
    w0, b0 = affine(k0, ensemble_size, in_features, HIDDEN)
    w1, b1 = affine(k1, ensemble_size, HIDDEN, HIDDEN)
    w2, b2 = affine(k2, ensemble_size, HIDDEN, HIDDEN)
    w3, b3 = affine(k3, ensemble_size, HIDDEN, out_features)

    # PyTorch module stores inputs_mu/sigma as zeros; sigma=0 would divide by
    # zero, so emulate post-fit_input_stats state deterministically.
    mu = jax.random.normal(k4, (1, in_features), dtype=jnp.float32) * 0.1
    sigma = jnp.ones((1, in_features), dtype=jnp.float32)

    max_logvar = jnp.ones((1, out_features // 2), dtype=jnp.float32) / 2.0
    min_logvar = -jnp.ones((1, out_features // 2), dtype=jnp.float32) * 10.0
    return (mu, sigma, w0, b0, w1, b1, w2, b2, w3, b3, max_logvar, min_logvar)


def reference_forward(x, params):
    """Pure-JAX reference mirroring the PyTorch forward (ret_logvar=False)."""
    (mu, sigma, w0, b0, w1, b1, w2, b2, w3, b3, max_logvar, min_logvar) = params
    swish = lambda z: z * jax.nn.sigmoid(z)
    h = (x - mu) / sigma
    h = swish(jnp.einsum('ebf,efh->ebh', h, w0) + b0)
    h = swish(jnp.einsum('ebf,efh->ebh', h, w1) + b1)
    h = swish(jnp.einsum('ebf,efh->ebh', h, w2) + b2)
    out = jnp.einsum('ebf,efh->ebh', h, w3) + b3
    K = max_logvar.shape[-1]
    mean = out[:, :, :K]
    logvar = out[:, :, K:]
    logvar = max_logvar - jax.nn.softplus(max_logvar - logvar)
    logvar = min_logvar + jax.nn.softplus(logvar - min_logvar)
    return mean, jnp.exp(logvar)


if __name__ == "__main__":
    ensemble_size = 2
    in_features = 16
    out_features = 8       # mean / logvar each out_features//2 = 4
    batch = 16

    key = jax.random.PRNGKey(0)
    pkey, xkey, xkey2 = jax.random.split(key, 3)
    params = init_params(pkey, ensemble_size, in_features, out_features)
    x = jax.random.normal(xkey, (ensemble_size, batch, in_features),
                          dtype=jnp.float32)

    ref_mean, ref_var = reference_forward(x, params)

    # f32 MXU operands + exact sigmoid: tight check.
    mean, var = pt_model_forward(x, params, compute_dtype=jnp.float32)
    jax.block_until_ready((mean, var))
    assert mean.shape == ref_mean.shape and var.shape == ref_var.shape
    assert jnp.allclose(mean, ref_mean, atol=1e-3, rtol=1e-3)
    assert jnp.allclose(var, ref_var, atol=1e-3, rtol=1e-3)

    # bf16 MXU operands (default, f32 accumulate/epilogue): loose check.
    # prepare_params once, reuse (hoisted weight fold/pad/cast).
    prep_bf16 = prepare_params(params, compute_dtype=jnp.bfloat16)
    mean_bf, var_bf = pt_model_forward_prepared(x, prep_bf16)
    jax.block_until_ready((mean_bf, var_bf))
    assert jnp.allclose(mean_bf, ref_mean, atol=5e-2, rtol=5e-2)
    assert jnp.allclose(var_bf, ref_var, atol=5e-2, rtol=5e-2)

    # Multi-batch-tile case with B not divisible by TB (validates B_pad/strip).
    batch2 = 40
    x2 = jax.random.normal(xkey2, (ensemble_size, batch2, in_features),
                           dtype=jnp.float32)
    ref_mean2, ref_var2 = reference_forward(x2, params)
    mean2, var2 = pt_model_forward(x2, params, compute_dtype=jnp.float32,
                                   batch_tile=16)
    jax.block_until_ready((mean2, var2))
    assert mean2.shape == ref_mean2.shape and var2.shape == ref_var2.shape
    assert jnp.allclose(mean2, ref_mean2, atol=1e-3, rtol=1e-3)
    assert jnp.allclose(var2, ref_var2, atol=1e-3, rtol=1e-3)

    print("KERNEL_OK")
</pallas_src>

<mosaic_0001>
module attributes {stable_mosaic.version = 11 : i64} {
  func.func @_mlp_kernel(%arg0: i32, %arg1: i32, %arg2: memref<1x16x16xf32, #tpu.memory_space<vmem>>, %arg3: memref<1x16x256xf32, #tpu.memory_space<vmem>>, %arg4: memref<1x1x256xf32, #tpu.memory_space<vmem>>, %arg5: memref<1x256x256xf32, #tpu.memory_space<vmem>>, %arg6: memref<1x1x256xf32, #tpu.memory_space<vmem>>, %arg7: memref<1x256x256xf32, #tpu.memory_space<vmem>>, %arg8: memref<1x1x256xf32, #tpu.memory_space<vmem>>, %arg9: memref<1x256x128xf32, #tpu.memory_space<vmem>>, %arg10: memref<1x1x128xf32, #tpu.memory_space<vmem>>, %arg11: memref<1x128xf32, #tpu.memory_space<vmem>>, %arg12: memref<1x128xf32, #tpu.memory_space<vmem>>, %arg13: memref<1x16x128xf32, #tpu.memory_space<vmem>>) attributes {dimension_semantics = [#tpu.dimension_semantics<parallel>, #tpu.dimension_semantics<parallel>], iteration_bounds = array<i64: 2, 1>, scalar_prefetch = 0 : i64, scratch_operands = 0 : i64, tpu.core_type = #tpu.core_type<tc>, window_params = [{transform_indices = @transform_0, window_bounds = array<i64: 1, 16, 16>}, {transform_indices = @transform_1, window_bounds = array<i64: 1, 16, 256>}, {transform_indices = @transform_2, window_bounds = array<i64: 1, 1, 256>}, {transform_indices = @transform_3, window_bounds = array<i64: 1, 256, 256>}, {transform_indices = @transform_4, window_bounds = array<i64: 1, 1, 256>}, {transform_indices = @transform_5, window_bounds = array<i64: 1, 256, 256>}, {transform_indices = @transform_6, window_bounds = array<i64: 1, 1, 256>}, {transform_indices = @transform_7, window_bounds = array<i64: 1, 256, 128>}, {transform_indices = @transform_8, window_bounds = array<i64: 1, 1, 128>}, {pipeline_mode = #tpu.pipeline_mode<synchronous>, transform_indices = @transform_9, window_bounds = array<i64: 1, 128>}, {pipeline_mode = #tpu.pipeline_mode<synchronous>, transform_indices = @transform_10, window_bounds = array<i64: 1, 128>}, {transform_indices = @transform_11, window_bounds = array<i64: 1, 16, 128>}]} {
    %c0 = arith.constant 0 : index
    %c0_0 = arith.constant 0 : index
    %c0_1 = arith.constant 0 : index
    %0 = vector.load %arg2[%c0, %c0_0, %c0_1] : memref<1x16x16xf32, #tpu.memory_space<vmem>>, vector<1x16x16xf32>
    %1 = vector.shape_cast %0 : vector<1x16x16xf32> to vector<16x16xf32>
    %c0_2 = arith.constant 0 : index
    %c0_3 = arith.constant 0 : index
    %c0_4 = arith.constant 0 : index
    %2 = vector.load %arg3[%c0_2, %c0_3, %c0_4] : memref<1x16x256xf32, #tpu.memory_space<vmem>>, vector<1x16x256xf32>
    %3 = vector.shape_cast %2 : vector<1x16x256xf32> to vector<16x256xf32>
    %cst = arith.constant dense<0.000000e+00> : vector<16x256xf32>
    %4 = tpu.matmul %1, %3, %cst {dimension_numbers = #tpu.dot_dimension_numbers<[1], [0], [0], [1], [0, 0, 1, 1], [], []>} : vector<16x16xf32>, vector<16x256xf32>, vector<16x256xf32> -> vector<16x256xf32>
    %c0_5 = arith.constant 0 : index
    %c0_6 = arith.constant 0 : index
    %c0_7 = arith.constant 0 : index
    %5 = vector.load %arg4[%c0_5, %c0_6, %c0_7] : memref<1x1x256xf32, #tpu.memory_space<vmem>>, vector<1x1x256xf32>
    %6 = vector.shape_cast %5 : vector<1x1x256xf32> to vector<1x256xf32>
    %7 = vector.broadcast %6 : vector<1x256xf32> to vector<16x256xf32>
    %8 = arith.addf %4, %7 : vector<16x256xf32>
    %9 = arith.negf %8 : vector<16x256xf32>
    %10 = math.exp %9 : vector<16x256xf32>
    %cst_8 = arith.constant 1.000000e+00 : f32
    %11 = vector.broadcast %cst_8 : f32 to vector<16x256xf32>
    %12 = arith.addf %11, %10 : vector<16x256xf32>
    %13 = arith.divf %11, %12 : vector<16x256xf32>
    %14 = arith.mulf %8, %13 : vector<16x256xf32>
    %c0_9 = arith.constant 0 : index
    %c0_10 = arith.constant 0 : index
    %c0_11 = arith.constant 0 : index
    %15 = vector.load %arg5[%c0_9, %c0_10, %c0_11] : memref<1x256x256xf32, #tpu.memory_space<vmem>>, vector<1x256x256xf32>
    %16 = vector.shape_cast %15 : vector<1x256x256xf32> to vector<256x256xf32>
    %cst_12 = arith.constant dense<0.000000e+00> : vector<16x256xf32>
    %17 = tpu.matmul %14, %16, %cst_12 {dimension_numbers = #tpu.dot_dimension_numbers<[1], [0], [0], [1], [0, 0, 1, 1], [], []>} : vector<16x256xf32>, vector<256x256xf32>, vector<16x256xf32> -> vector<16x256xf32>
    %c0_13 = arith.constant 0 : index
    %c0_14 = arith.constant 0 : index
    %c0_15 = arith.constant 0 : index
    %18 = vector.load %arg6[%c0_13, %c0_14, %c0_15] : memref<1x1x256xf32, #tpu.memory_space<vmem>>, vector<1x1x256xf32>
    %19 = vector.shape_cast %18 : vector<1x1x256xf32> to vector<1x256xf32>
    %20 = vector.broadcast %19 : vector<1x256xf32> to vector<16x256xf32>
    %21 = arith.addf %17, %20 : vector<16x256xf32>
    %22 = arith.negf %21 : vector<16x256xf32>
    %23 = math.exp %22 : vector<16x256xf32>
    %cst_16 = arith.constant 1.000000e+00 : f32
    %24 = vector.broadcast %cst_16 : f32 to vector<16x256xf32>
    %25 = arith.addf %24, %23 : vector<16x256xf32>
    %26 = arith.divf %24, %25 : vector<16x256xf32>
    %27 = arith.mulf %21, %26 : vector<16x256xf32>
    %c0_17 = arith.constant 0 : index
    %c0_18 = arith.constant 0 : index
    %c0_19 = arith.constant 0 : index
    %28 = vector.load %arg7[%c0_17, %c0_18, %c0_19] : memref<1x256x256xf32, #tpu.memory_space<vmem>>, vector<1x256x256xf32>
    %29 = vector.shape_cast %28 : vector<1x256x256xf32> to vector<256x256xf32>
    %cst_20 = arith.constant dense<0.000000e+00> : vector<16x256xf32>
    %30 = tpu.matmul %27, %29, %cst_20 {dimension_numbers = #tpu.dot_dimension_numbers<[1], [0], [0], [1], [0, 0, 1, 1], [], []>} : vector<16x256xf32>, vector<256x256xf32>, vector<16x256xf32> -> vector<16x256xf32>
    %c0_21 = arith.constant 0 : index
    %c0_22 = arith.constant 0 : index
    %c0_23 = arith.constant 0 : index
    %31 = vector.load %arg8[%c0_21, %c0_22, %c0_23] : memref<1x1x256xf32, #tpu.memory_space<vmem>>, vector<1x1x256xf32>
    %32 = vector.shape_cast %31 : vector<1x1x256xf32> to vector<1x256xf32>
    %33 = vector.broadcast %32 : vector<1x256xf32> to vector<16x256xf32>
    %34 = arith.addf %30, %33 : vector<16x256xf32>
    %35 = arith.negf %34 : vector<16x256xf32>
    %36 = math.exp %35 : vector<16x256xf32>
    %cst_24 = arith.constant 1.000000e+00 : f32
    %37 = vector.broadcast %cst_24 : f32 to vector<16x256xf32>
    %38 = arith.addf %37, %36 : vector<16x256xf32>
    %39 = arith.divf %37, %38 : vector<16x256xf32>
    %40 = arith.mulf %34, %39 : vector<16x256xf32>
    %c0_25 = arith.constant 0 : index
    %c0_26 = arith.constant 0 : index
    %c0_27 = arith.constant 0 : index
    %41 = vector.load %arg9[%c0_25, %c0_26, %c0_27] : memref<1x256x128xf32, #tpu.memory_space<vmem>>, vector<1x256x128xf32>
    %42 = vector.shape_cast %41 : vector<1x256x128xf32> to vector<256x128xf32>
    %cst_28 = arith.constant dense<0.000000e+00> : vector<16x128xf32>
    %43 = tpu.matmul %40, %42, %cst_28 {dimension_numbers = #tpu.dot_dimension_numbers<[1], [0], [0], [1], [0, 0, 1, 1], [], []>} : vector<16x256xf32>, vector<256x128xf32>, vector<16x128xf32> -> vector<16x128xf32>
    %c0_29 = arith.constant 0 : index
    %c0_30 = arith.constant 0 : index
    %c0_31 = arith.constant 0 : index
    %44 = vector.load %arg10[%c0_29, %c0_30, %c0_31] : memref<1x1x128xf32, #tpu.memory_space<vmem>>, vector<1x1x128xf32>
    %45 = vector.shape_cast %44 : vector<1x1x128xf32> to vector<1x128xf32>
    %46 = vector.broadcast %45 : vector<1x128xf32> to vector<16x128xf32>
    %47 = arith.addf %43, %46 : vector<16x128xf32>
    %c0_32 = arith.constant 0 : index
    %c0_33 = arith.constant 0 : index
    %48 = vector.load %arg11[%c0_32, %c0_33] : memref<1x128xf32, #tpu.memory_space<vmem>>, vector<1x128xf32>
    %c0_34 = arith.constant 0 : index
    %c0_35 = arith.constant 0 : index
    %49 = vector.load %arg12[%c0_34, %c0_35] : memref<1x128xf32, #tpu.memory_space<vmem>>, vector<1x128xf32>
    %50 = vector.broadcast %48 : vector<1x128xf32> to vector<16x128xf32>
    %51 = arith.subf %50, %47 : vector<16x128xf32>
    %cst_36 = arith.constant 0.000000e+00 : f32
    %52 = vector.broadcast %cst_36 : f32 to vector<16x128xf32>
    %53 = arith.maximumf %51, %52 : vector<16x128xf32>
    %54 = math.absf %51 : vector<16x128xf32>
    %cst_37 = arith.constant 0.000000e+00 : f32
    %55 = vector.broadcast %cst_37 : f32 to vector<16x128xf32>
    %56 = arith.subf %55, %54 : vector<16x128xf32>
    %57 = math.exp %56 : vector<16x128xf32>
    %58 = math.log1p %57 : vector<16x128xf32>
    %59 = arith.addf %53, %58 : vector<16x128xf32>
    %60 = vector.broadcast %48 : vector<1x128xf32> to vector<16x128xf32>
    %61 = arith.subf %60, %59 : vector<16x128xf32>
    %62 = vector.broadcast %49 : vector<1x128xf32> to vector<16x128xf32>
    %63 = arith.subf %61, %62 : vector<16x128xf32>
    %cst_38 = arith.constant 0.000000e+00 : f32
    %64 = vector.broadcast %cst_38 : f32 to vector<16x128xf32>
    %65 = arith.maximumf %63, %64 : vector<16x128xf32>
    %66 = math.absf %63 : vector<16x128xf32>
    %cst_39 = arith.constant 0.000000e+00 : f32
    %67 = vector.broadcast %cst_39 : f32 to vector<16x128xf32>
    %68 = arith.subf %67, %66 : vector<16x128xf32>
    %69 = math.exp %68 : vector<16x128xf32>
    %70 = math.log1p %69 : vector<16x128xf32>
    %71 = arith.addf %65, %70 : vector<16x128xf32>
    %72 = vector.broadcast %49 : vector<1x128xf32> to vector<16x128xf32>
    %73 = arith.addf %72, %71 : vector<16x128xf32>
    %74 = math.exp %73 : vector<16x128xf32>
    %75 = tpu.iota {dimensions = array<i32: 1>} : vector<16x128xi32>
    %c4_i32 = arith.constant 4 : i32
    %76 = vector.broadcast %c4_i32 : i32 to vector<16x128xi32>
    %77 = arith.cmpi sge, %75, %76 : vector<16x128xi32>
    %c8_i32 = arith.constant 8 : i32
    %78 = vector.broadcast %c8_i32 : i32 to vector<16x128xi32>
    %79 = arith.cmpi slt, %75, %78 : vector<16x128xi32>
    %80 = arith.andi %77, %79 : vector<16x128xi1>
    %81 = arith.select %80, %74, %47 : vector<16x128xi1>, vector<16x128xf32>
    %c0_40 = arith.constant 0 : index
    %c0_41 = arith.constant 0 : index
    %c0_42 = arith.constant 0 : index
    %82 = vector.load %arg13[%c0_40, %c0_41, %c0_42] : memref<1x16x128xf32, #tpu.memory_space<vmem>>, vector<1x16x128xf32>
    %83 = vector.shape_cast %82 : vector<1x16x128xf32> to vector<16x128xf32>
    %84 = vector.shape_cast %81 : vector<16x128xf32> to vector<1x16x128xf32>
    tpu.vector_store %arg13[%c0_40, %c0_41, %c0_42], %84 {strides = array<i32>} : memref<1x16x128xf32, #tpu.memory_space<vmem>>, vector<1x16x128xf32>,
    return
  }
  func.func @transform_0(%arg0: i32, %arg1: i32) -> (i32, i32, i32) {
    %c0_i32 = arith.constant 0 : i32
    %c0_i32_0 = arith.constant 0 : i32
    return %arg0, %arg1, %c0_i32 : i32, i32, i32
  }
  func.func @transform_1(%arg0: i32, %arg1: i32) -> (i32, i32, i32) {
    %c0_i32 = arith.constant 0 : i32
    %c0_i32_0 = arith.constant 0 : i32
    %c0_i32_1 = arith.constant 0 : i32
    return %arg0, %c0_i32, %c0_i32_0 : i32, i32, i32
  }
  func.func @transform_2(%arg0: i32, %arg1: i32) -> (i32, i32, i32) {
    %c0_i32 = arith.constant 0 : i32
    %c0_i32_0 = arith.constant 0 : i32
    %c0_i32_1 = arith.constant 0 : i32
    return %arg0, %c0_i32, %c0_i32_0 : i32, i32, i32
  }
  func.func @transform_3(%arg0: i32, %arg1: i32) -> (i32, i32, i32) {
    %c0_i32 = arith.constant 0 : i32
    %c0_i32_0 = arith.constant 0 : i32
    %c0_i32_1 = arith.constant 0 : i32
    return %arg0, %c0_i32, %c0_i32_0 : i32, i32, i32
  }
  func.func @transform_4(%arg0: i32, %arg1: i32) -> (i32, i32, i32) {
    %c0_i32 = arith.constant 0 : i32
    %c0_i32_0 = arith.constant 0 : i32
    %c0_i32_1 = arith.constant 0 : i32
    return %arg0, %c0_i32, %c0_i32_0 : i32, i32, i32
  }
  func.func @transform_5(%arg0: i32, %arg1: i32) -> (i32, i32, i32) {
    %c0_i32 = arith.constant 0 : i32
    %c0_i32_0 = arith.constant 0 : i32
    %c0_i32_1 = arith.constant 0 : i32
    return %arg0, %c0_i32, %c0_i32_0 : i32, i32, i32
  }
  func.func @transform_6(%arg0: i32, %arg1: i32) -> (i32, i32, i32) {
    %c0_i32 = arith.constant 0 : i32
    %c0_i32_0 = arith.constant 0 : i32
    %c0_i32_1 = arith.constant 0 : i32
    return %arg0, %c0_i32, %c0_i32_0 : i32, i32, i32
  }
  func.func @transform_7(%arg0: i32, %arg1: i32) -> (i32, i32, i32) {
    %c0_i32 = arith.constant 0 : i32
    %c0_i32_0 = arith.constant 0 : i32
    %c0_i32_1 = arith.constant 0 : i32
    return %arg0, %c0_i32, %c0_i32_0 : i32, i32, i32
  }
  func.func @transform_8(%arg0: i32, %arg1: i32) -> (i32, i32, i32) {
    %c0_i32 = arith.constant 0 : i32
    %c0_i32_0 = arith.constant 0 : i32
    %c0_i32_1 = arith.constant 0 : i32
    return %arg0, %c0_i32, %c0_i32_0 : i32, i32, i32
  }
  func.func @transform_9(%arg0: i32, %arg1: i32) -> (i32, i32) {
    %c0_i32 = arith.constant 0 : i32
    %c0_i32_0 = arith.constant 0 : i32
    %c0_i32_1 = arith.constant 0 : i32
    return %c0_i32, %c0_i32_0 : i32, i32
  }
  func.func @transform_10(%arg0: i32, %arg1: i32) -> (i32, i32) {
    %c0_i32 = arith.constant 0 : i32
    %c0_i32_0 = arith.constant 0 : i32
    %c0_i32_1 = arith.constant 0 : i32
    return %c0_i32, %c0_i32_0 : i32, i32
  }
  func.func @transform_11(%arg0: i32, %arg1: i32) -> (i32, i32, i32) {
    %c0_i32 = arith.constant 0 : i32
    %c0_i32_0 = arith.constant 0 : i32
    return %arg0, %arg1, %c0_i32 : i32, i32, i32
  }
}

</mosaic_0001>

<bundles_post_ra>
// kernel: tpu_custom_call.1
= control target key start
LH: loop header
LB: loop body
LE: loop exit
PB: predicated region body
PF: predicated region fallthrough
CT: control target
= control target key end

     0   :  { %s2883_s0 = inlined_call_operand.hbm [shape: f32[2,16,16], index: 0, kind: input, shape index: {}]   ;;  %s2884_s1 = inlined_call_operand.hbm [shape: f32[2,16,256], index: 1, kind: input, shape index: {}]   ;;  %s2885_s2 = inlined_call_operand.vmem [shape: f32[2,1,256], index: 2, kind: input, shape index: {}]   ;;  %s2886_s3 = inlined_call_operand.hbm [shape: f32[2,256,256], index: 3, kind: input, shape index: {}]   ;;  %s2887_s4 = inlined_call_operand.vmem [shape: f32[2,1,256], index: 4, kind: input, shape index: {}]   ;;  %s2888_s5 = inlined_call_operand.hbm [shape: f32[2,256,256], index: 5, kind: input, shape index: {}]   ;;  %s2889_s6 = inlined_call_operand.vmem [shape: f32[2,1,256], index: 6, kind: input, shape index: {}]   ;;  %s2890_s7 = inlined_call_operand.hbm [shape: f32[2,256,128], index: 7, kind: input, shape index: {}]   ;;  %s2891_s8 = inlined_call_operand.vmem [shape: f32[2,1,128], index: 8, kind: input, shape index: {}]   ;;  %s2892_s9 = inlined_call_operand.vmem [shape: f32[1,128], index: 9, kind: input, shape index: {}]   ;;  %s2893_s10 = inlined_call_operand.vmem [shape: f32[1,128], index: 10, kind: input, shape index: {}]   ;;  %s2894_s11 = inlined_call_operand.hbm [shape: f32[2,16,128], index: 11, kind: output, shape index: {}]  }
   0x1   :  { %2911 = sst [smem:[#allocation23_spill]] %s2884_s1 }
   0x2   :  { %2912 = sst [smem:[#allocation24_spill]] %s2887_s4 }
   0x3   :  { %2913 = sst [smem:[#allocation25_spill]] %s2888_s5 }
   0x4   :  { %2914 = sst [smem:[#allocation26_spill]] %s2889_s6 }
   0x5   :  { %2915 = sst [smem:[#allocation27_spill]] %s2891_s8 }
   0x6   :  { %2916 = sst [smem:[#allocation28_spill]] %s2892_s9 }
   0x7   :  { %2917 = sst [smem:[#allocation29_spill]] %s2893_s10 }
   0x8   :  { %2918 = sst [smem:[#allocation30_spill]] %s2894_s11 }
   0x9   :  { %16 = vsyncpa [#allocation3], 0 }
   0xa   :  { %18 = vsyncpa [#allocation3 + $0x1], 0 }
   0xb   :  { %19 = vsyncpa [#allocation6], 0 }
   0xc   :  { %21 = vsyncpa [#allocation6 + $0x1], 0 }
   0xd   :  { %22 = vsyncpa [#allocation9], 0 }
   0xe   :  { %24 = vsyncpa [#allocation9 + $0x1], 0 }
   0xf   :  { %25 = vsyncpa [#allocation4], 0 }
  0x10   :  { %27 = vsyncpa [#allocation4 + $0x1], 0  ;;  %s2310_s17 = smov 0   ;;  %s2312_s18 = smov 0  }
  0x11   :  { %s2314_s19 = smov 0   ;;  %s2316_s20 = smov 0  }
  0x12   :  { %s2318_s21 = smov 0   ;;  %s2320_s22 = smov 0  }
  0x13 LB: > { %2919 = sst [smem:[#allocation16_spill]] %s2215_s17  ;;  %s2341_s23 = sadd.s32 4294967295, %s2235_s22   ;;  %s2235_s22 = sphi %s2320_s22, %s33_s22   ;;  %s2231_s21 = sphi %s2318_s21, %s2959_s21   ;;  %s2227_s20 = sphi %s2316_s20, %s2958_s20   ;;  %s2223_s19 = sphi %s2314_s19, %s2954_s19   ;;  %s2219_s18 = sphi %s2312_s18, %s2957_s18   ;;  %s2215_s17 = sphi %s2310_s17, %s2956_s17  }
  0x14   : > { %2920 = sst [smem:[#allocation17_spill]] %s2223_s19  ;;  %s1580_s24 = sadd.s32 4294967294, %s2235_s22  }
  0x15   : > { %2921 = sst [smem:[#allocation18_spill]] %s2235_s22  ;;  %s45_s25 = sadd.s32 1, %s2231_s21 }
  0x16   : > { %s54_s26 = sadd.s32 1, %s2223_s19  ;;  %p47_p0 = scmp.ge.s32.totalorder %s45_s25, 2 }
  0x17   : > { %p61_p1 = scmp.ne.s32.totalorder %s2223_s19, %s2219_s18  ;;  %p62_p2 = scmp.eq.s32.totalorder %s2235_s22, 0 }
  0x18   : > { %p67_p3 = scmp.ne.s32.totalorder %s2219_s18, %s2215_s17  ;;  %s2961_s25 = smov (%p47_p0, %s45_s25), 0 }
  0x19   : > { %2922 = sst [smem:[#allocation19_spill]] %s2961_s25  ;;  %p2353_p4 = por %p62_p2, %p61_p1 }
  0x1a   : > { %p68_p5 = scmp.eq.s32.totalorder %s2341_s23, 0  ;;  %s49_s28 = ssub.s32 %s2231_s21, %s2961_s25 }
  0x1b   : > { %p343_p6 = scmp.eq.s32.totalorder %s2341_s23, 1  ;;  %p52_p7 = scmp.eq.s32.totalorder %s49_s28, 0 }
  0x1c   : > { %p2361_p8 = por %p68_p5, %p67_p3  ;;  %p349_p10 = scmp.eq.s32.totalorder %s1580_s24, 1 }
  0x1d   : > { %p2365_p9 = por %p343_p6, %p61_p1  ;;  %p1870_p13 = scmp.lt.s32.totalorder %s2235_s22, 2 }
  0x1e   : > { %s2924_s29 = scalar_select %p2361_p8, 1, 0 }
  0x1f   : > { %s2925_s30 = scalar_select %p2365_p9, 1, 0 }
  0x20   : > { %s2370_s12 = scalar_select %p52_p7, %s2223_s19, %s54_s26  }
  0x21   : > { %2926 = sst [smem:[#allocation20_spill]] %s2925_s30  ;;  %p2372_p11 = por %p349_p10, %p67_p3 }
  0x22   : > { %2927 = sst [smem:[#allocation21_spill]] %s2370_s12  ;;  %s2379_s14 = sand.u32 1, %s2223_s19  }
  0x23   : > { %s2928_s13 = scalar_select %p2372_p11, 1, 0 }
  0x24   : > { %s2900_s15 = sand.u32 1, %s2235_s22   ;;  %s1586_s16 = sshll.u32 %s2379_s14, 5 }
  0x25   : > { %2929 = sst [smem:[#allocation22_spill]] %s2928_s13  ;;  %p2385_p0 = pnand %p1870_p13, %p2353_p4 }
  0x26   : > { %s1631_s24 = sshll.u32 %s2231_s21, 9  ;;  %s2931_s1 = sld [smem:[#allocation23_spill]] }
  0x27   : > { %s402_s19 = scalar_lea.vmem [#allocation5], %s1586_s16  ;;  %s2399_s27 = scalar_lea.sflag [#allocation6], %s2900_s15 }
  0x28   : > { %s409_s13 = sshll.u32 %s402_s19, 4  ;;  %p2405_p2 = pneg %p2385_p0  ;;  %s2395_s13 = int_to_ptr.vmem [resolvable:$true] %s409_s13 }
  0x2c   : > { %s2393_s12 = scalar_lea.hbm %s2931_s1, %s1631_s24  ;;  %s2000_s19 = scalar_lea.hbm %s2931_s1, 1024 }
  0x2d   : > { %s1995_s17 = scalar_lea.hbm %s2393_s12, 512  ;;  %p2001_p5 = scmp.lt.u32.totalorder %s2393_s12, %s2931_s1 }
  0x2e   : > { %p1996_p1 = scmp.ne.s32.totalorder %s2393_s12, %s1995_s17  ;;  %p2002_p6 = scmp.lt.u32.totalorder %s2000_s19, %s1995_s17 }
  0x2f   : > { %p2004_p10 = scmp.lt.u32.totalorder %s1995_s17, %s2393_s12 }
  0x30   : > { %p1998_p3 = pnand %p2405_p2, %p1996_p1  ;;  %p2003_p7 = por %p2002_p6, %p2001_p5 }
  0x32   : > { %p1999_p4 = pneg %p1998_p3  ;;  %p2005_p13 = por %p2004_p10, %p2003_p7 }
  0x34   : > { %p2006_p12 = pnand %p2005_p13, %p1999_p4 }
  0x36   : > { %2009 = shalt.err (!%p2006_p12)
}
  0x37   : > { %s2010_s15 = scalar_lea.vmem %s2395_s13, 512  ;;  %s2237_s25 = smov [#allocation5]  }
  0x38   : > { %p2011_p1 = scmp.ne.s32.totalorder %s2395_s13, %s2010_s15  ;;  %s2015_s24 = sshll.u32 %s2237_s25, 4  ;;  %s2016_s24 = int_to_ptr.vmem [resolvable:$false] %s2015_s24 }
  0x39   : > { %s2017_s16 = scalar_lea.vmem %s2016_s24, 1024  ;;  %p2018_p9 = scmp.lt.s32.totalorder %s2395_s13, %s2016_s24 }
  0x3a   : > { %p2013_p3 = pnand %p2011_p1, %p2405_p2  ;;  %p2019_p8 = scmp.lt.s32.totalorder %s2017_s16, %s2010_s15 }
  0x3c   : > { %p2014_p11 = pneg %p2013_p3  ;;  %p2020_p5 = por %p2019_p8, %p2018_p9 }
  0x3e   : > { %p2021_p6 = pnand %p2020_p5, %p2014_p11 }
  0x40   : > { %2024 = shalt.err (!%p2021_p6)
}
  0x41   : > { %s2905_s17 = smov 256   ;;  %s2907_s19 = smov 16  }
  0x42   : > { %1856 = dma.hbm_to_vmem [thread:$0]  (!%p2385_p0), %s2393_s12, 512, %s2395_s13, %s2399_s27, %s2905_s17, %s2905_s17, %s2907_s19  }
  0x43   : > { %p1598_p12 = scmp.ge.s32.totalorder %s2235_s22, 1  ;;  %p507_p8 = scmp.lt.s32.totalorder %s2235_s22, 3 }
  0x44   : > { %s1589_s15 = sshll.u32 %s2379_s14, 9  ;;  %s1632_s26 = sshll.u32 %s2231_s21, 13 }
  0x45   : > { %p2436_p9 = pnand %p1598_p12, %p507_p8  ;;  %s2443_s1 = scalar_lea.hbm %s2886_s3, %s1632_s26 }
  0x46   : > { %s430_s30 = scalar_lea.vmem [#allocation7], %s1589_s15  ;;  %s2934_s5 = sld [smem:[#allocation25_spill]] }
  0x47   : > { %s2933_s25 = scalar_select %p2436_p9, 1, 0 }
  0x48   : > { %s437_s10 = sshll.u32 %s430_s30, 4  ;;  %s458_s17 = scalar_lea.vmem [#allocation8], %s1589_s15  ;;  %s2445_s10 = int_to_ptr.vmem [resolvable:$true] %s437_s10 }
  0x49   : > { %s465_s19 = sshll.u32 %s458_s17, 4  ;;  %s2935_s24 = sand.u32 1, %s2235_s22   ;;  %s2452_s19 = int_to_ptr.vmem [resolvable:$true] %s465_s19 }
  0x4a   : > { %s2456_s16 = scalar_lea.sflag [#allocation9], %s2935_s24 }
  0x4c   : > { %s2450_s13 = scalar_lea.hbm %s2934_s5, %s1632_s26  ;;  %s2030_s26 = scalar_lea.hbm %s2934_s5, 16384 }
  0x4d   : > { %s2025_s8 = scalar_lea.hbm %s2450_s13, 8192  ;;  %p2031_p10 = scmp.lt.u32.totalorder %s2450_s13, %s2934_s5 }
  0x4e   : > { %p2026_p11 = scmp.ne.s32.totalorder %s2450_s13, %s2025_s8  ;;  %p2032_p13 = scmp.lt.u32.totalorder %s2030_s26, %s2025_s8 }
  0x4f   : > { %p2034_p3 = scmp.lt.u32.totalorder %s2025_s8, %s2450_s13 }
  0x50   : > { %p2028_p4 = pnand %p2026_p11, %p2405_p2  ;;  %p2033_p1 = por %p2032_p13, %p2031_p10 }
  0x52   : > { %p2029_p7 = pneg %p2028_p4  ;;  %p2035_p5 = por %p2034_p3, %p2033_p1 }
  0x54   : > { %p2036_p6 = pnand %p2035_p5, %p2029_p7 }
  0x56   : > { %2039 = shalt.err (!%p2036_p6)
}
  0x57   : > { %s2040_s17 = scalar_lea.vmem %s2452_s19, 8192  ;;  %s2240_s15 = smov [#allocation8]  }
  0x58   : > { %p2041_p12 = scmp.ne.s32.totalorder %s2452_s19, %s2040_s17  ;;  %s2045_s24 = sshll.u32 %s2240_s15, 4  ;;  %s2046_s24 = int_to_ptr.vmem [resolvable:$false] %s2045_s24 }
  0x59   : > { %s2047_s6 = scalar_lea.vmem %s2046_s24, 16384  ;;  %p2048_p4 = scmp.lt.s32.totalorder %s2452_s19, %s2046_s24 }
  0x5a   : > { %p2043_p8 = pnand %p2041_p12, %p2405_p2  ;;  %p2049_p9 = scmp.lt.s32.totalorder %s2047_s6, %s2040_s17 }
  0x5c   : > { %p2044_p11 = pneg %p2043_p8  ;;  %p2050_p10 = por %p2049_p9, %p2048_p4 }
  0x5e   : > { %p2051_p13 = pnand %p2050_p10, %p2044_p11 }
  0x60   : > { %2054 = shalt.err (!%p2051_p13)
}
  0x61   : > { %s2936_s8 = smov 16   ;;  %s2937_s30 = smov 256  }
  0x62   : > { %1862 = dma.hbm_to_vmem [thread:$0]  (!%p2385_p0), %s2450_s13, 8192, %s2452_s19, %s2456_s16, %s2937_s30, %s2937_s30, %s2936_s8  }
  0x63   : > { %s1583_s9 = sshll.u32 %s2379_s14, 4  ;;  %s1630_s26 = sshll.u32 %s2231_s21, 8 }
  0x64   : > { %s2488_s15 = scalar_lea.hbm %s2883_s0, %s1630_s26  ;;  %s379_s24 = scalar_lea.vmem [#allocation2], %s1583_s9 }
  0x65   : > { %s388_s6 = sshll.u32 %s379_s24, 4  ;;  %s1595_s5 = sshll.u32 %s2379_s14, 8  ;;  %s2490_s6 = int_to_ptr.vmem [resolvable:$true] %s388_s6 }
  0x66   : > { %s376_s22 = scalar_lea.sflag [#allocation3], %s2379_s14  ;;  %s2055_s4 = scalar_lea.hbm %s2488_s15, 256 }
  0x67   : > { %p2056_p9 = scmp.ne.s32.totalorder %s2488_s15, %s2055_s4  ;;  %s2060_s26 = scalar_lea.hbm %s2883_s0, 512 }
  0x68   : > { %p2061_p3 = scmp.lt.u32.totalorder %s2488_s15, %s2883_s0  ;;  %p2062_p5 = scmp.lt.u32.totalorder %s2060_s26, %s2055_s4 }
  0x69   : > { %p2058_p7 = pnand %p2056_p9, %p2405_p2  ;;  %p2064_p12 = scmp.lt.u32.totalorder %s2055_s4, %s2488_s15 }
  0x6a   : > { %p2063_p6 = por %p2062_p5, %p2061_p3 }
  0x6b   : > { %p2059_p1 = pneg %p2058_p7 }
  0x6c   : > { %p2065_p8 = por %p2064_p12, %p2063_p6 }
  0x6e   : > { %p2066_p11 = pnand %p2065_p8, %p2059_p1 }
  0x70   : > { %2069 = shalt.err (!%p2066_p11)
}
  0x71   : > { %s2070_s9 = scalar_lea.vmem %s2490_s6, 256  ;;  %s2241_s24 = smov [#allocation2]  }
  0x72   : > { %p2071_p4 = scmp.ne.s32.totalorder %s2490_s6, %s2070_s9  ;;  %s2075_s19 = sshll.u32 %s2241_s24, 4  ;;  %s2076_s19 = int_to_ptr.vmem [resolvable:$false] %s2075_s19 }
  0x73   : > { %s2077_s13 = scalar_lea.vmem %s2076_s19, 512  ;;  %p2078_p9 = scmp.lt.s32.totalorder %s2490_s6, %s2076_s19 }
  0x74   : > { %p2073_p10 = pnand %p2071_p4, %p2405_p2  ;;  %p2079_p7 = scmp.lt.s32.totalorder %s2077_s13, %s2070_s9 }
  0x76   : > { %p2074_p13 = pneg %p2073_p10  ;;  %p2080_p3 = por %p2079_p7, %p2078_p9 }
  0x78   : > { %p2081_p5 = pnand %p2080_p3, %p2074_p13 }
  0x7a   : > { %2084 = shalt.err (!%p2081_p5)
}
  0x7b   : > { %s2242_s4 = smov 128   ;;  %s2243_s26 = smov 8  }
  0x7c   : > { %1853 = dma.hbm_to_vmem [thread:$0]  (!%p2385_p0), %s2488_s15, 256, %s2490_s6, %s376_s22, %s2242_s4, %s2242_s4, %s2243_s26  }
  0x7d   : > { %s2085_s12 = scalar_lea.hbm %s2443_s1, 8192  ;;  %s2090_s24 = scalar_lea.hbm %s2886_s3, 16384 }
  0x7e   : > { %p2086_p1 = scmp.ne.s32.totalorder %s2443_s1, %s2085_s12  ;;  %p2091_p8 = scmp.lt.u32.totalorder %s2443_s1, %s2886_s3 }
  0x7f   : > { %p2092_p11 = scmp.lt.u32.totalorder %s2090_s24, %s2085_s12  ;;  %p2094_p10 = scmp.lt.u32.totalorder %s2085_s12, %s2443_s1 }
  0x80   : > { %p2088_p6 = pnand %p2086_p1, %p2405_p2 }
  0x81   : > { %p2093_p4 = por %p2092_p11, %p2091_p8 }
  0x82   : > { %p2089_p12 = pneg %p2088_p6 }
  0x83   : > { %p2095_p13 = por %p2094_p10, %p2093_p4 }
  0x85   : > { %p2096_p9 = pnand %p2095_p13, %p2089_p12 }
  0x87   : > { %2099 = shalt.err (!%p2096_p9)
}
  0x88   : > { %s2100_s22 = scalar_lea.vmem %s2445_s10, 8192  ;;  %s2244_s15 = smov [#allocation7]  }
  0x89   : > { %p2101_p7 = scmp.ne.s32.totalorder %s2445_s10, %s2100_s22  ;;  %s2105_s6 = sshll.u32 %s2244_s15, 4  ;;  %s2106_s6 = int_to_ptr.vmem [resolvable:$false] %s2105_s6 }
  0x8a   : > { %s2107_s17 = scalar_lea.vmem %s2106_s6, 16384  ;;  %p2108_p1 = scmp.lt.s32.totalorder %s2445_s10, %s2106_s6 }
  0x8b   : > { %p2103_p3 = pnand %p2101_p7, %p2405_p2  ;;  %p2109_p6 = scmp.lt.s32.totalorder %s2107_s17, %s2100_s22 }
  0x8d   : > { %p2104_p5 = pneg %p2103_p3  ;;  %p2110_p8 = por %p2109_p6, %p2108_p1 }
  0x8f   : > { %p2111_p11 = pnand %p2110_p8, %p2104_p5 }
  0x91   : > { %2114 = shalt.err (!%p2111_p11)
}
  0x92   : > { %1859 = dma.hbm_to_vmem [thread:$0]  (!%p2385_p0), %s2443_s1, 8192, %s2445_s10, %s2399_s27, %s2937_s30, %s2937_s30, %s2936_s8  }
  0x93   : > { %s1634_s12 = sshll.u32 %s2231_s21, 12  ;;  %s486_s13 = scalar_lea.vmem [#allocation10], %s1595_s5 }
  0x94   : > { %s2549_s19 = scalar_lea.hbm %s2890_s7, %s1634_s12  ;;  %s493_s22 = sshll.u32 %s486_s13, 4  ;;  %s2553_s22 = int_to_ptr.vmem [resolvable:$true] %s493_s22 }
  0x95   : > { %s2115_s15 = scalar_lea.hbm %s2549_s19, 4096  ;;  %s2120_s27 = scalar_lea.hbm %s2890_s7, 8192 }
  0x96   : > { %p2116_p12 = scmp.ne.s32.totalorder %s2549_s19, %s2115_s15  ;;  %p2121_p13 = scmp.lt.u32.totalorder %s2549_s19, %s2890_s7 }
  0x97   : > { %p2122_p9 = scmp.lt.u32.totalorder %s2120_s27, %s2115_s15  ;;  %p2124_p3 = scmp.lt.u32.totalorder %s2115_s15, %s2549_s19 }
  0x98   : > { %p2118_p4 = pnand %p2116_p12, %p2405_p2 }
  0x99   : > { %p2123_p7 = por %p2122_p9, %p2121_p13 }
  0x9a   : > { %p2119_p10 = pneg %p2118_p4 }
  0x9b   : > { %p2125_p5 = por %p2124_p3, %p2123_p7 }
  0x9d   : > { %p2126_p1 = pnand %p2125_p5, %p2119_p10 }
  0x9f   : > { %2129 = shalt.err (!%p2126_p1)
}
  0xa0   : > { %s2130_s5 = scalar_lea.vmem %s2553_s22, 4096  ;;  %s2245_s14 = smov [#allocation10]  }
  0xa1   : > { %p2131_p6 = scmp.ne.s32.totalorder %s2553_s22, %s2130_s5  ;;  %s2135_s6 = sshll.u32 %s2245_s14, 4  ;;  %s2136_s6 = int_to_ptr.vmem [resolvable:$false] %s2135_s6 }
  0xa2   : > { %s2137_s17 = scalar_lea.vmem %s2136_s6, 8192  ;;  %p2138_p12 = scmp.lt.s32.totalorder %s2553_s22, %s2136_s6 }
  0xa3   : > { %p2133_p8 = pnand %p2131_p6, %p2405_p2  ;;  %p2139_p4 = scmp.lt.s32.totalorder %s2137_s17, %s2130_s5 }
  0xa5   : > { %p2134_p11 = pneg %p2133_p8  ;;  %p2140_p13 = por %p2139_p4, %p2138_p12 }
  0xa7   : > { %p2141_p9 = pnand %p2140_p13, %p2134_p11 }
  0xa9   : > { %2144 = shalt.err (!%p2141_p9)
}
  0xaa   : > { %1865 = dma.hbm_to_vmem [thread:$0]  (!%p2385_p0), %s2549_s19, 4096, %s2553_s22, %s2456_s16, %s2242_s4, %s2242_s4, %s2243_s26  }
  0xab   : > { %p2938_p2 = scmp.ne.s32.totalorder %s2933_s25, 0 }
  0xac   : > { %s2583_s11 = sand.u32 (!%p2938_p2), 1, %s2219_s18   ;;  %p2939_p10 = scmp.ne.s32.totalorder (!%p2938_p2), %s2924_s29, 0 }
  0xad   : > { %511 = sbr.rel (%p2938_p2) target bundleno = 1254 (0x4e6), region = 64  ;;  %s1599_s12 = sshll.u32 (!%p2938_p2), %s2583_s11, 4 }
  0xae   : > { %s514_s9 = scalar_lea.sflag (!%p2938_p2), [#allocation3], %s2583_s11  ;;  %s2589_s28 = scalar_lea.vmem (!%p2938_p2), [#allocation2], %s1599_s12 }
  0xb4   : > { %2198 = dma.done.wait (%p2939_p10), %s514_s9, 256  }
  0xb5   : > { %2200 = vsyncadd (%p2939_p10), %s514_s9, 4294967040  ;;  %s522_s25 = sand.u32 1, %s2341_s23   ;;  %s1600_s16 = sshll.u32 %s2583_s11, 5 }
  0xb6   : > { %s523_s4 = scalar_lea.sflag [#allocation6], %s522_s25  ;;  %s526_s26 = scalar_lea.vmem [#allocation5], %s1600_s16 }
  0xb7   : > { %2202 = dma.done.wait (%p2939_p10), %s523_s4, 8704  }
  0xb8   : > { %2204 = vsyncadd (%p2939_p10), %s523_s4, 4294958592  ;;  %s1601_s24 = sshll.u32 %s2583_s11, 9  ;;  %s541_s13 = scalar_lea.sflag [#allocation9], %s522_s25 }
  0xb9   : > { %s2602_s19 = scalar_lea.vmem [#allocation7], %s1601_s24  ;;  %s2604_s22 = scalar_lea.vmem [#allocation8], %s1601_s24 }
  0xba   : > { %2206 = dma.done.wait (%p2939_p10), %s541_s13, 12288  }
  0xbb   : > { %2208 = vsyncadd (%p2939_p10), %s541_s13, 4294955008  ;;  %v2246_v0 = vmov 0.0   ;;  %v647_v1 = vld [vmem:[%s526_s26 + $0x8] sm:$0xff]  ;;  %v649_v2 = vld [vmem:[%s526_s26 + $0x18] sm:$0xff]  ;;  %vm662_vm0 = vcmask 130048   ;;  %p628_p0 = scmp.lt.s32.totalorder %s2227_s20, 1 }
  0xbc   : > { %733 = vmatprep.mubr.f32.mxu0 %v2246_v0  ;;  %v646_v3 = vld [vmem:[%s526_s26] sm:$0xff]  ;;  %v1674_v4 = vpack.c.bf16 %v649_v2, %v647_v1  ;;  %v648_v5 = vld [vmem:[%s526_s26 + $0x10] sm:$0xff]  ;;  %v775_v8 = vld [vmem:[%s2602_s19 + $0x8] sm:$0xff]  ;;  %s2940_s30 = sld [smem:[#allocation24_spill]]  ;;  %s1603_s14 = sshll.u32 %s2583_s11, 8 }
  0xbd   : > { %v1676_v6 = vpack.c.bf16 %v648_v5, %v646_v3  ;;  %v644_v7 = vld [vmem:[%s2589_s28] sm:$0xff]  ;;  %v777_v9 = vld [vmem:[%s2602_s19 + $0x18] sm:$0xff]  ;;  %v779_v13 = vld [vmem:[%s2602_s19 + $0x28] sm:$0xff]  ;;  %s2712_s23 = scalar_select %p628_p0, %s2227_s20, 1 }
  0xbe   : > { %v774_v10 = vld [vmem:[%s2602_s19] sm:$0xff]  ;;  %1675 = vmatprep.subr.bf16.mxu0 %v1674_v4  ;;  %v1678_v11 = vpack.c.bf16 %v777_v9, %v775_v8  ;;  %v776_v12 = vld [vmem:[%s2602_s19 + $0x10] sm:$0xff]  ;;  %v781_v14 = vld [vmem:[%s2602_s19 + $0x38] sm:$0xff]  ;;  %s2767_s6 = scalar_lea.vmem [#allocation10], %s1603_s14  ;;  %s2942_s26 = sld [smem:[#allocation27_spill]] }
  0xbf   : > { %1677 = vmatpush1.bf16.msra.mxu0 %v1676_v6  ;;  %v1680_v15 = vpack.c.bf16 %v776_v12, %v774_v10  ;;  %v1682_v16 = vpack.c.bf16 %v781_v14, %v779_v13  ;;  %v778_v17 = vld [vmem:[%s2602_s19 + $0x20] sm:$0xff]  ;;  %v780_v18 = vld [vmem:[%s2602_s19 + $0x30] sm:$0xff]  ;;  %v783_v19 = vld [vmem:[%s2602_s19 + $0x48] sm:$0xff]  ;;  %s2715_s29 = sshll.u32 %s2712_s23, 1  ;;  %s2944_s15 = sld [smem:[#allocation29_spill]] }
  0xc0   : > { %1679 = vmatprep.subr.bf16.mxu1 %v1678_v11  ;;  %v785_v20 = vld [vmem:[%s2602_s19 + $0x58] sm:$0xff]  ;;  %v1684_v21 = vpack.c.bf16 %v780_v18, %v778_v17  ;;  %v782_v23 = vld [vmem:[%s2602_s19 + $0x40] sm:$0xff]  ;;  %v784_v24 = vld [vmem:[%s2602_s19 + $0x50] sm:$0xff]  ;;  %s631_s10 = scalar_lea.vmem %s2885_s2, %s2715_s29  ;;  %s2945_s1 = sld [smem:[#allocation20_spill]] }
  0xc1   : > { %1681 = vmatpush1.bf16.msra.mxu1 %v1680_v15  ;;  %v1686_v22 = vpack.c.bf16 %v785_v20, %v783_v19  ;;  %v645_v25 = vld [vmem:[%s2589_s28 + $0x8] sm:$0xff]  ;;  %v1688_v28 = vpack.c.bf16 %v784_v24, %v782_v23  ;;  %v786_v30 = vld [vmem:[%s2602_s19 + $0x60] sm:$0xff]  ;;  %v788_v31 = vld [vmem:[%s2602_s19 + $0x70] sm:$0xff]  ;;  %s2941_s28 = sld [smem:[#allocation26_spill]]  ;;  %s1635_s8 = sshll.u32 %s2227_s20, 8 }
  0xc2   : > { %1608 = vmatmul.mubr.msk.f32.vlgmr.msra.gmra.mrb[0].mxu0 %vm662_vm0, %v644_v7  ;;  %1683 = vmatprep.subr.bf16.mxu1 %v1682_v16  ;;  %v787_v26 = vld [vmem:[%s2602_s19 + $0x68] sm:$0xff]  ;;  %v789_v27 = vld [vmem:[%s2602_s19 + $0x78] sm:$0xff]  ;;  %v1692_v34 = vpack.c.bf16 %v788_v31, %v786_v30  ;;  %v790_v36 = vld [vmem:[%s2602_s19 + $0x80] sm:$0xff]  ;;  %s635_s5 = scalar_lea.vmem %s2940_s30, %s2715_s29  ;;  %s2946_s14 = sld [smem:[#allocation30_spill]] }
  0xc3   : > { %739 = vmatprep.mubr.f32.mxu0 %v2246_v0  ;;  %v1690_v29 = vpack.c.bf16 %v789_v27, %v787_v26  ;;  %v791_v32 = vld [vmem:[%s2602_s19 + $0x88] sm:$0xff]  ;;  %v793_v33 = vld [vmem:[%s2602_s19 + $0x98] sm:$0xff]  ;;  %v792_v37 = vld [vmem:[%s2602_s19 + $0x90] sm:$0xff]  ;;  %s2247_s20 = smov [#allocation11]  }
  0xc4   : > { %v1694_v35 = vpack.c.bf16 %v793_v33, %v791_v32  ;;  %v795_v38 = vld [vmem:[%s2602_s19 + $0xa8] sm:$0xff]  ;;  %v797_v39 = vld [vmem:[%s2602_s19 + $0xb8] sm:$0xff]  ;;  %v1696_v40 = vpack.c.bf16 %v792_v37, %v790_v36  ;;  %v794_v42 = vld [vmem:[%s2602_s19 + $0xa0] sm:$0xff]  ;;  %s642_s24 = scalar_lea.vmem %s2942_s26, %s2712_s23  ;;  %s2149_s9 = sshll.u32 %s2247_s20, 4  ;;  %s2150_s9 = int_to_ptr.vmem [resolvable:$false] %s2149_s9 }
  0xc5   : > { %1685 = vmatpush1.bf16.msra.mxu1 %v1684_v21  ;;  %v1698_v41 = vpack.c.bf16 %v797_v39, %v795_v38  ;;  %v796_v43 = vld [vmem:[%s2602_s19 + $0xb0] sm:$0xff]  ;;  %v799_v44 = vld [vmem:[%s2602_s19 + $0xc8] sm:$0xff]  ;;  %v801_v45 = vld [vmem:[%s2602_s19 + $0xd8] sm:$0xff] }
  0xc6   : > { %1609 = vmatmul.mubr.msk.f32.gmra.mrb[2].mxu0 %vm662_vm0, %v645_v25  ;;  %1687 = vmatprep.subr.bf16.mxu1 %v1686_v22  ;;  %v1700_v46 = vpack.c.bf16 %v796_v43, %v794_v42  ;;  %v1702_v47 = vpack.c.bf16 %v801_v45, %v799_v44  ;;  %v798_v48 = vld [vmem:[%s2602_s19 + $0xc0] sm:$0xff]  ;;  %v800_v49 = vld [vmem:[%s2602_s19 + $0xd0] sm:$0xff]  ;;  %v803_v50 = vld [vmem:[%s2602_s19 + $0xe8] sm:$0xff]  ;;  %p2947_p3 = scmp.ne.s32.totalorder %s2945_s1, 0 }
  0xc7   : > { %v805_v51 = vld [vmem:[%s2602_s19 + $0xf8] sm:$0xff]  ;;  %v1704_v52 = vpack.c.bf16 %v800_v49, %v798_v48  ;;  %v802_v54 = vld [vmem:[%s2602_s19 + $0xe0] sm:$0xff]  ;;  %v804_v55 = vld [vmem:[%s2602_s19 + $0xf0] sm:$0xff]  ;;  %s639_s25 = scalar_lea.vmem %s2941_s28, %s2715_s29  ;;  %s2151_s28 = scalar_lea.vmem %s2150_s9, 512 }
  0xc8   : > { %v1706_v53 = vpack.c.bf16 %v805_v51, %v803_v50  ;;  %v1708_v56 = vpack.c.bf16 %v804_v55, %v802_v54  ;;  %v807_v57 = vld [vmem:[%s2602_s19 + $0x108] sm:$0xff]  ;;  %v809_v58 = vld [vmem:[%s2602_s19 + $0x118] sm:$0xff]  ;;  %v806_v60 = vld [vmem:[%s2602_s19 + $0x100] sm:$0xff] }
  0xc9   : > { %1689 = vmatpush1.bf16.msra.mxu1 %v1688_v28  ;;  %v1710_v59 = vpack.c.bf16 %v809_v58, %v807_v57  ;;  %v808_v61 = vld [vmem:[%s2602_s19 + $0x110] sm:$0xff]  ;;  %v811_v63 = vld [vmem:[%s2602_s19 + $0x128] sm:$0xff]  ;;  %v813_v0 = vld [vmem:[%s2602_s19 + $0x138] sm:$0xff] }
  0xca   : > { %1691 = vmatprep.subr.bf16.mxu1 %v1690_v29  ;;  %v1712_v62 = vpack.c.bf16 %v808_v61, %v806_v60  ;;  %v1714_v1 = vpack.c.bf16 %v813_v0, %v811_v63  ;;  %v810_v2 = vld [vmem:[%s2602_s19 + $0x120] sm:$0xff]  ;;  %v812_v3 = vld [vmem:[%s2602_s19 + $0x130] sm:$0xff]  ;;  %v815_v5 = vld [vmem:[%s2602_s19 + $0x148] sm:$0xff] }
  0xcb   : > { %v1716_v4 = vpack.c.bf16 %v812_v3, %v810_v2  ;;  %v817_v6 = vld [vmem:[%s2602_s19 + $0x158] sm:$0xff]  ;;  %v814_v8 = vld [vmem:[%s2602_s19 + $0x140] sm:$0xff]  ;;  %v816_v9 = vld [vmem:[%s2602_s19 + $0x150] sm:$0xff] }
  0xcc   : > { %v1718_v7 = vpack.c.bf16 %v817_v6, %v815_v5  ;;  %v1720_v10 = vpack.c.bf16 %v816_v9, %v814_v8  ;;  %v819_v11 = vld [vmem:[%s2602_s19 + $0x168] sm:$0xff]  ;;  %v821_v12 = vld [vmem:[%s2602_s19 + $0x178] sm:$0xff]  ;;  %v818_v14 = vld [vmem:[%s2602_s19 + $0x160] sm:$0xff] }
  0xcd   : > { %1693 = vmatpush1.bf16.msra.mxu1 %v1692_v34  ;;  %v1722_v13 = vpack.c.bf16 %v821_v12, %v819_v11  ;;  %v820_v15 = vld [vmem:[%s2602_s19 + $0x170] sm:$0xff]  ;;  %v823_v17 = vld [vmem:[%s2602_s19 + $0x188] sm:$0xff]  ;;  %v825_v18 = vld [vmem:[%s2602_s19 + $0x198] sm:$0xff] }
  0xce   : > { %1695 = vmatprep.subr.bf16.mxu1 %v1694_v35  ;;  %v1724_v16 = vpack.c.bf16 %v820_v15, %v818_v14  ;;  %v1726_v19 = vpack.c.bf16 %v825_v18, %v823_v17  ;;  %v822_v20 = vld [vmem:[%s2602_s19 + $0x180] sm:$0xff]  ;;  %v824_v21 = vld [vmem:[%s2602_s19 + $0x190] sm:$0xff]  ;;  %v827_v23 = vld [vmem:[%s2602_s19 + $0x1a8] sm:$0xff] }
  0xcf   : > { %v1728_v22 = vpack.c.bf16 %v824_v21, %v822_v20  ;;  %v829_v24 = vld [vmem:[%s2602_s19 + $0x1b8] sm:$0xff]  ;;  %v826_v26 = vld [vmem:[%s2602_s19 + $0x1a0] sm:$0xff]  ;;  %v828_v27 = vld [vmem:[%s2602_s19 + $0x1b0] sm:$0xff] }
  0xd0   : > { %v1730_v25 = vpack.c.bf16 %v829_v24, %v827_v23  ;;  %v1732_v28 = vpack.c.bf16 %v828_v27, %v826_v26  ;;  %v831_v29 = vld [vmem:[%s2602_s19 + $0x1c8] sm:$0xff]  ;;  %v833_v30 = vld [vmem:[%s2602_s19 + $0x1d8] sm:$0xff]  ;;  %v830_v32 = vld [vmem:[%s2602_s19 + $0x1c0] sm:$0xff] }
  0xd1   : > { %1697 = vmatpush1.bf16.msra.mxu1 %v1696_v40  ;;  %v1734_v31 = vpack.c.bf16 %v833_v30, %v831_v29  ;;  %v832_v33 = vld [vmem:[%s2602_s19 + $0x1d0] sm:$0xff]  ;;  %v835_v35 = vld [vmem:[%s2602_s19 + $0x1e8] sm:$0xff]  ;;  %v837_v36 = vld [vmem:[%s2602_s19 + $0x1f8] sm:$0xff] }
  0xd2   : > { %1699 = vmatprep.subr.bf16.mxu1 %v1698_v41  ;;  %v1736_v34 = vpack.c.bf16 %v832_v33, %v830_v32  ;;  %v1738_v37 = vpack.c.bf16 %v837_v36, %v835_v35  ;;  %v834_v38 = vld [vmem:[%s2602_s19 + $0x1e0] sm:$0xff]  ;;  %v836_v39 = vld [vmem:[%s2602_s19 + $0x1f0] sm:$0xff]  ;;  %v956_v41 = vld [vmem:[%s2604_s22 + $0x8] sm:$0xff] }
  0xd3   : > { %v1740_v40 = vpack.c.bf16 %v836_v39, %v834_v38  ;;  %v958_v42 = vld [vmem:[%s2604_s22 + $0x18] sm:$0xff]  ;;  %v955_v43 = vld [vmem:[%s2604_s22] sm:$0xff]  ;;  %v957_v45 = vld [vmem:[%s2604_s22 + $0x10] sm:$0xff] }
  0xd4   : > { %v1742_v44 = vpack.c.bf16 %v958_v42, %v956_v41  ;;  %v1744_v48 = vpack.c.bf16 %v957_v45, %v955_v43  ;;  %v959_v50 = vld [vmem:[%s2604_s22 + $0x20] sm:$0xff]  ;;  %v961_v51 = vld [vmem:[%s2604_s22 + $0x30] sm:$0xff]  ;;  %v968_v58 = vld [vmem:[%s2604_s22 + $0x68] sm:$0xff] }
  0xd5   : > { %1701 = vmatpush1.bf16.msra.mxu1 %v1700_v46  ;;  %v960_v46 = vld [vmem:[%s2604_s22 + $0x28] sm:$0xff]  ;;  %v1748_v54 = vpack.c.bf16 %v961_v51, %v959_v50  ;;  %v965_v57 = vld [vmem:[%s2604_s22 + $0x50] sm:$0xff] }
  0xd6   : > { %1703 = vmatprep.subr.bf16.mxu1 %v1702_v47  ;;  %v962_v47 = vld [vmem:[%s2604_s22 + $0x38] sm:$0xff]  ;;  %1743 = vmatprep.subr.bf16.mxu0 %v1742_v44  ;;  %v969_v63 = vld [vmem:[%s2604_s22 + $0x70] sm:$0xff]  ;;  %v972_v0 = vld [vmem:[%s2604_s22 + $0x88] sm:$0xff] }
  0xd7   : > { %v1746_v49 = vpack.c.bf16 %v962_v47, %v960_v46  ;;  %1745 = vmatpush1.bf16.msra.mxu0 %v1744_v48  ;;  %v973_v5 = vld [vmem:[%s2604_s22 + $0x90] sm:$0xff]  ;;  %v976_v6 = vld [vmem:[%s2604_s22 + $0xa8] sm:$0xff] }
  0xd8   : > { %v977_v11 = vld [vmem:[%s2604_s22 + $0xb0] sm:$0xff]  ;;  %v980_v12 = vld [vmem:[%s2604_s22 + $0xc8] sm:$0xff] }
  0xd9   : > { %1705 = vmatpush1.bf16.msra.mxu1 %v1704_v52  ;;  %v964_v52 = vld [vmem:[%s2604_s22 + $0x48] sm:$0xff]  ;;  %1747 = vmatprep.subr.bf16.mxu0 %v1746_v49  ;;  %v981_v17 = vld [vmem:[%s2604_s22 + $0xd0] sm:$0xff] }
  0xda   : > { %1707 = vmatprep.subr.bf16.mxu1 %v1706_v53  ;;  %v966_v53 = vld [vmem:[%s2604_s22 + $0x58] sm:$0xff]  ;;  %v984_v18 = vld [vmem:[%s2604_s22 + $0xe8] sm:$0xff]  ;;  %v985_v23 = vld [vmem:[%s2604_s22 + $0xf0] sm:$0xff] }
  0xdb   : > { %v1750_v55 = vpack.c.bf16 %v966_v53, %v964_v52  ;;  %1749 = vmatpush1.bf16.msra.mxu0 %v1748_v54 }
  0xdd   : > { %1709 = vmatpush1.bf16.msra.mxu1 %v1708_v56  ;;  %v963_v56 = vld [vmem:[%s2604_s22 + $0x40] sm:$0xff]  ;;  %1751 = vmatprep.subr.bf16.mxu0 %v1750_v55 }
  0xde   : > { %1711 = vmatprep.subr.bf16.mxu1 %v1710_v59  ;;  %v970_v59 = vld [vmem:[%s2604_s22 + $0x78] sm:$0xff]  ;;  %v1752_v60 = vpack.c.bf16 %v965_v57, %v963_v56 }
  0xdf   : > { %v1754_v61 = vpack.c.bf16 %v970_v59, %v968_v58 }
  0xe0   : > { %1753 = vmatpush1.bf16.msra.mxu0 %v1752_v60  ;;  %v988_v60 = vld [vmem:[%s2604_s22 + $0x108] sm:$0xff] }
  0xe1   : > { %1713 = vmatpush1.bf16.msra.mxu1 %v1712_v62  ;;  %v967_v62 = vld [vmem:[%s2604_s22 + $0x60] sm:$0xff]  ;;  %1755 = vmatprep.subr.bf16.mxu0 %v1754_v61  ;;  %v990_v61 = vld [vmem:[%s2604_s22 + $0x118] sm:$0xff] }
  0xe2   : > { %1715 = vmatprep.subr.bf16.mxu1 %v1714_v1  ;;  %v974_v1 = vld [vmem:[%s2604_s22 + $0x98] sm:$0xff]  ;;  %v1756_v2 = vpack.c.bf16 %v969_v63, %v967_v62  ;;  %v1774_v62 = vpack.c.bf16 %v990_v61, %v988_v60  ;;  %v987_v63 = vld [vmem:[%s2604_s22 + $0x100] sm:$0xff] }
  0xe3   : > { %v1758_v3 = vpack.c.bf16 %v974_v1, %v972_v0  ;;  %v989_v0 = vld [vmem:[%s2604_s22 + $0x110] sm:$0xff] }
  0xe4   : > { %1757 = vmatpush1.bf16.msra.mxu0 %v1756_v2  ;;  %v1776_v1 = vpack.c.bf16 %v989_v0, %v987_v63  ;;  %v992_v2 = vld [vmem:[%s2604_s22 + $0x128] sm:$0xff] }
  0xe5   : > { %1717 = vmatpush1.bf16.msra.mxu1 %v1716_v4  ;;  %v971_v4 = vld [vmem:[%s2604_s22 + $0x80] sm:$0xff]  ;;  %1759 = vmatprep.subr.bf16.mxu0 %v1758_v3  ;;  %v994_v3 = vld [vmem:[%s2604_s22 + $0x138] sm:$0xff] }
  0xe6   : > { %1719 = vmatprep.subr.bf16.mxu1 %v1718_v7  ;;  %v978_v7 = vld [vmem:[%s2604_s22 + $0xb8] sm:$0xff]  ;;  %v1760_v8 = vpack.c.bf16 %v973_v5, %v971_v4  ;;  %v1778_v4 = vpack.c.bf16 %v994_v3, %v992_v2  ;;  %v991_v5 = vld [vmem:[%s2604_s22 + $0x120] sm:$0xff] }
  0xe7   : > { %v1762_v9 = vpack.c.bf16 %v978_v7, %v976_v6  ;;  %v993_v6 = vld [vmem:[%s2604_s22 + $0x130] sm:$0xff] }
  0xe8   : > { %1761 = vmatpush1.bf16.msra.mxu0 %v1760_v8  ;;  %v1780_v7 = vpack.c.bf16 %v993_v6, %v991_v5  ;;  %v996_v8 = vld [vmem:[%s2604_s22 + $0x148] sm:$0xff] }
  0xe9   : > { %1721 = vmatpush1.bf16.msra.mxu1 %v1720_v10  ;;  %v975_v10 = vld [vmem:[%s2604_s22 + $0xa0] sm:$0xff]  ;;  %1763 = vmatprep.subr.bf16.mxu0 %v1762_v9  ;;  %v998_v9 = vld [vmem:[%s2604_s22 + $0x158] sm:$0xff] }
  0xea   : > { %1723 = vmatprep.subr.bf16.mxu1 %v1722_v13  ;;  %v982_v13 = vld [vmem:[%s2604_s22 + $0xd8] sm:$0xff]  ;;  %v1764_v14 = vpack.c.bf16 %v977_v11, %v975_v10  ;;  %v1782_v10 = vpack.c.bf16 %v998_v9, %v996_v8  ;;  %v995_v11 = vld [vmem:[%s2604_s22 + $0x140] sm:$0xff] }
  0xeb   : > { %v1766_v15 = vpack.c.bf16 %v982_v13, %v980_v12  ;;  %v997_v12 = vld [vmem:[%s2604_s22 + $0x150] sm:$0xff] }
  0xec   : > { %1765 = vmatpush1.bf16.msra.mxu0 %v1764_v14  ;;  %v1784_v13 = vpack.c.bf16 %v997_v12, %v995_v11  ;;  %v1000_v14 = vld [vmem:[%s2604_s22 + $0x168] sm:$0xff] }
  0xed   : > { %1725 = vmatpush1.bf16.msra.mxu1 %v1724_v16  ;;  %v979_v16 = vld [vmem:[%s2604_s22 + $0xc0] sm:$0xff]  ;;  %1767 = vmatprep.subr.bf16.mxu0 %v1766_v15  ;;  %v1002_v15 = vld [vmem:[%s2604_s22 + $0x178] sm:$0xff] }
  0xee   : > { %1727 = vmatprep.subr.bf16.mxu1 %v1726_v19  ;;  %v986_v19 = vld [vmem:[%s2604_s22 + $0xf8] sm:$0xff]  ;;  %v1768_v20 = vpack.c.bf16 %v981_v17, %v979_v16  ;;  %v1786_v16 = vpack.c.bf16 %v1002_v15, %v1000_v14  ;;  %v999_v17 = vld [vmem:[%s2604_s22 + $0x160] sm:$0xff]  ;;  %v1153_v15 = vld [vmem:[%s2767_s6 + $0x88] sm:$0xff] }
  0xef   : > { %v1770_v21 = vpack.c.bf16 %v986_v19, %v984_v18  ;;  %v1001_v18 = vld [vmem:[%s2604_s22 + $0x170] sm:$0xff]  ;;  %v1152_v14 = vld [vmem:[%s2767_s6 + $0x80] sm:$0xff] }
  0xf0   : > { %1769 = vmatpush1.bf16.msra.mxu0 %v1768_v20  ;;  %v1788_v19 = vpack.c.bf16 %v1001_v18, %v999_v17  ;;  %v1004_v20 = vld [vmem:[%s2604_s22 + $0x188] sm:$0xff]  ;;  %v1136_v17 = vld [vmem:[%s2767_s6] sm:$0xff] }
  0xf1   : > { %1729 = vmatpush1.bf16.msra.mxu1 %v1728_v22  ;;  %v983_v22 = vld [vmem:[%s2604_s22 + $0xe0] sm:$0xff]  ;;  %1771 = vmatprep.subr.bf16.mxu0 %v1770_v21  ;;  %v1006_v21 = vld [vmem:[%s2604_s22 + $0x198] sm:$0xff]  ;;  %v1137_v18 = vld [vmem:[%s2767_s6 + $0x8] sm:$0xff] }
  0xf2   : > { %1731 = vmatprep.subr.bf16.mxu1 %v1730_v25  ;;  %v1772_v24 = vpack.c.bf16 %v985_v23, %v983_v22  ;;  %v652_v25 = vlaneseq  ;;  %v1790_v22 = vpack.c.bf16 %v1006_v21, %v1004_v20  ;;  %v1003_v23 = vld [vmem:[%s2604_s22 + $0x180] sm:$0xff]  ;;  %v1154_v20 = vld [vmem:[%s2767_s6 + $0x90] sm:$0xff]  ;;  %v1155_v21 = vld [vmem:[%s2767_s6 + $0x98] sm:$0xff] }
  0xf4   : > { %1773 = vmatpush1.bf16.msra.mxu0 %v1772_v24  ;;  %v653_v26 = vshrl.u32 %v652_v25, 7  ;;  %v1005_v24 = vld [vmem:[%s2604_s22 + $0x190] sm:$0xff] }
  0xf5   : > { %1733 = vmatpush1.bf16.msra.mxu1 %v1732_v28  ;;  %v650_v28 = vld [vmem:[%s631_s10] sm:$0x3]  ;;  %1775 = vmatprep.subr.bf16.mxu0 %v1774_v62  ;;  %s626_s10 = scalar_lea.vmem [#allocation11], %s1599_s12  ;;  %s1346_s12 = scalar_lea.sflag [#allocation4], %s2583_s11 }
  0xf6   : > { %1735 = vmatprep.subr.bf16.mxu1 %v1734_v31  ;;  %v2722_v27 = vsub.s32 0, %v653_v26  ;;  %v2724_v29 = vsub.s32 1, %v653_v26  ;;  %v1792_v26 = vpack.c.bf16 %v1005_v24, %v1003_v23  ;;  %v1138_v23 = vld [vmem:[%s2767_s6 + $0x10] sm:$0xff]  ;;  %v1139_v24 = vld [vmem:[%s2767_s6 + $0x18] sm:$0xff]  ;;  %s1361_s27 = sshll.u32 %s626_s10, 4  ;;  %s2828_s27 = int_to_ptr.vmem [resolvable:$true] %s1361_s27 }
  0xf7   : > { %s2145_s17 = scalar_lea.vmem %s2828_s27, 256  ;;  %p2152_p6 = scmp.lt.s32.totalorder %s2828_s27, %s2150_s9 }
  0xf8   : > { %v655_v30 = vrot.slane %v650_v28, %v2722_v27  ;;  %v659_v31 = vrot.slane %v650_v28, %v2724_v29  ;;  %1777 = vmatpush1.bf16.msra.mxu0 %v1776_v1  ;;  %v1008_v28 = vld [vmem:[%s2604_s22 + $0x1a8] sm:$0xff]  ;;  %p2146_p7 = scmp.ne.s32.totalorder %s2828_s27, %s2145_s17  ;;  %p2153_p8 = scmp.lt.s32.totalorder %s2151_s28, %s2145_s17 }
  0xf9   : > { %1737 = vmatpush1.bf16.msra.mxu1 %v1736_v34  ;;  %1779 = vmatprep.subr.bf16.mxu0 %v1778_v4 }
  0xfa   : > { %1739 = vmatprep.subr.bf16.mxu1 %v1738_v37  ;;  %p2147_p5 = pnand %p2146_p7, %p2947_p3  ;;  %p2154_p11 = por %p2153_p8, %p2152_p6 }
  0xfc   : > { %1781 = vmatpush1.bf16.msra.mxu0 %v1780_v7  ;;  %p2148_p1 = pneg %p2147_p5 }
  0xfd   : > { %1741 = vmatpush1.bf16.msra.mxu1 %v1740_v40  ;;  %1783 = vmatprep.subr.bf16.mxu0 %v1782_v10 }
  0xfe   : > { %p2155_p12 = pnand %p2154_p11, %p2148_p1 }
 0x100   : > { %1785 = vmatpush1.bf16.msra.mxu0 %v1784_v13 }
 0x101   : > { %1787 = vmatprep.subr.bf16.mxu0 %v1786_v16  ;;  %v1806_v16 = vpack.c.bf16 %v1153_v15, %v1152_v14 }
 0x103   : > { %1807 = vmatprep.subr.bf16.mxu1 %v1806_v16 }
 0x104   : > { %1789 = vmatpush1.bf16.msra.mxu0 %v1788_v19  ;;  %v1808_v19 = vpack.c.bf16 %v1137_v18, %v1136_v17 }
 0x105   : > { %1791 = vmatprep.subr.bf16.mxu0 %v1790_v22  ;;  %v1810_v22 = vpack.c.bf16 %v1155_v21, %v1154_v20 }
 0x108   : > { %1793 = vmatpush1.bf16.msra.mxu0 %v1792_v26  ;;  %v1812_v26 = vpack.c.bf16 %v1139_v24, %v1138_v23 }
 0x195   : > { %v735_v32 = vpop.f32.mrb[0].mxu0 }
 0x196   : > { %v736_v33 = vadd.f32 %v735_v32, %v655_v30  ;;  %v737_v34 = vpop.f32.mrb[1].mxu0  ;;  %v1007_v32 = vld [vmem:[%s2604_s22 + $0x1a0] sm:$0xff] }
 0x197   : > { %v738_v35 = vadd.f32 %v737_v34, %v659_v31 }
 0x198   : > { %v1610_v36 = vmul.f32 -1.442695, %v736_v33 }
 0x199   : > { %v1611_v37 = vmul.f32 -1.442695, %v738_v35  ;;  %v741_v38 = vpop.f32.mrb[2].mxu0 }
 0x19a   : > { %1927 = vpow2.f32 %v1610_v36  ;;  %v742_v39 = vadd.f32 %v741_v38, %v655_v30  ;;  %v743_v40 = vpop.f32.mrb[3].mxu0  ;;  %v1010_v30 = vld [vmem:[%s2604_s22 + $0x1b8] sm:$0xff]  ;;  %v1011_v38 = vld [vmem:[%s2604_s22 + $0x1c0] sm:$0xff] }
 0x19b   : > { %1929 = vpow2.f32 %v1611_v37  ;;  %v744_v41 = vadd.f32 %v743_v40, %v659_v31  ;;  %v1794_v31 = vpack.c.bf16 %v1010_v30, %v1008_v28  ;;  %v1014_v36 = vld [vmem:[%s2604_s22 + $0x1d8] sm:$0xff]  ;;  %v1156_v28 = vld [vmem:[%s2767_s6 + $0xa0] sm:$0xff]  ;;  %v1157_v30 = vld [vmem:[%s2767_s6 + $0xa8] sm:$0xff] }
 0x19c   : > { %v1612_v42 = vmul.f32 -1.442695, %v742_v39 }
 0x19d   : > { %v1613_v43 = vmul.f32 -1.442695, %v744_v41  ;;  %1795 = vmatprep.subr.bf16.mxu0 %v1794_v31  ;;  %v1814_v31 = vpack.c.bf16 %v1157_v30, %v1156_v28 }
 0x19e   : > { %1931 = vpow2.f32 %v1612_v42  ;;  %v1018_v42 = vld [vmem:[%s2604_s22 + $0x1f8] sm:$0xff] }
 0x19f   : > { %1933 = vpow2.f32 %v1613_v43 }
 0x1a4   : > { %v1928_v44 = vpop.eup %1927 }
 0x1a5   : > { %v1930_v45 = vpop.eup %1929  ;;  %v758_v46 = vadd.f32 1.0, %v1928_v44  ;;  %v1015_v44 = vld [vmem:[%s2604_s22 + $0x1e0] sm:$0xff] }
 0x1a6   : > { %v759_v47 = vadd.f32 1.0, %v1930_v45  ;;  %v1017_v45 = vld [vmem:[%s2604_s22 + $0x1f0] sm:$0xff] }
 0x1a7   : > { %1935 = vrcp.f32 %v758_v46  ;;  %v1804_v46 = vpack.c.bf16 %v1017_v45, %v1015_v44  ;;  %v1144_v44 = vld [vmem:[%s2767_s6 + $0x40] sm:$0xff]  ;;  %v1145_v45 = vld [vmem:[%s2767_s6 + $0x48] sm:$0xff] }
 0x1a8   : > { %v1932_v48 = vpop.eup %1931  ;;  %1937 = vrcp.f32 %v759_v47  ;;  %v838_v47 = vld [vmem:[%s635_s5] sm:$0x3] }
 0x1a9   : > { %v1934_v49 = vpop.eup %1933  ;;  %v760_v50 = vadd.f32 1.0, %v1932_v48  ;;  %v843_v48 = vrot.slane %v838_v47, %v2722_v27 }
 0x1aa   : > { %v761_v51 = vadd.f32 1.0, %v1934_v49  ;;  %v847_v49 = vrot.slane %v838_v47, %v2724_v29  ;;  %v1162_v47 = vld [vmem:[%s2767_s6 + $0xd0] sm:$0xff] }
 0x1ab   : > { %1939 = vrcp.f32 %v760_v50 }
 0x1ac   : > { %1941 = vrcp.f32 %v761_v51 }
 0x1b1   : > { %v1936_v52 = vpop.eup %1935 }
 0x1b2   : > { %v1938_v53 = vpop.eup %1937  ;;  %v770_v55 = vmul.f32 %v1936_v52, %v736_v33  ;;  %v1009_v33 = vld [vmem:[%s2604_s22 + $0x1b0] sm:$0xff] }
 0x1b3   : > { %v771_v54 = vmul.f32 %v1938_v53, %v738_v35  ;;  %v1796_v34 = vpack.c.bf16 %v1009_v33, %v1007_v32  ;;  %v1012_v35 = vld [vmem:[%s2604_s22 + $0x1c8] sm:$0xff]  ;;  %v1140_v32 = vld [vmem:[%s2767_s6 + $0x20] sm:$0xff] }
 0x1b4   : > { %v1798_v37 = vpack.c.bf16 %v1014_v36, %v1012_v35  ;;  %v1141_v33 = vld [vmem:[%s2767_s6 + $0x28] sm:$0xff]  ;;  %v1158_v35 = vld [vmem:[%s2767_s6 + $0xb0] sm:$0xff]  ;;  %v1159_v36 = vld [vmem:[%s2767_s6 + $0xb8] sm:$0xff] }
 0x1b5   : > { %v1940_v56 = vpop.eup %1939  ;;  %914 = vmatprep.mubr.f32.mxu1 %v771_v54  ;;  %1797 = vmatpush1.bf16.msra.mxu0 %v1796_v34  ;;  %v1816_v34 = vpack.c.bf16 %v1141_v33, %v1140_v32 }
 0x1b6   : > { %v1942_v57 = vpop.eup %1941  ;;  %915 = vmatmul.mubr.f32.vlgmr.msra.gmra.mrb[0].mxu1 %v770_v55  ;;  %v772_v59 = vmul.f32 %v1940_v56, %v742_v39  ;;  %v1013_v39 = vld [vmem:[%s2604_s22 + $0x1d0] sm:$0xff]  ;;  %1799 = vmatprep.subr.bf16.mxu0 %v1798_v37  ;;  %v1818_v37 = vpack.c.bf16 %v1159_v36, %v1158_v35 }
 0x1b7   : > { %v773_v58 = vmul.f32 %v1942_v57, %v744_v41  ;;  %v1800_v40 = vpack.c.bf16 %v1013_v39, %v1011_v38  ;;  %v1016_v41 = vld [vmem:[%s2604_s22 + $0x1e8] sm:$0xff]  ;;  %1809 = vmatpush3.bf16.msra.mxu1 %v1808_v19  ;;  %v1142_v38 = vld [vmem:[%s2767_s6 + $0x30] sm:$0xff]  ;;  %v1143_v39 = vld [vmem:[%s2767_s6 + $0x38] sm:$0xff]  ;;  %s2943_s22 = sld [smem:[#allocation28_spill]] }
 0x1b8   : > { %v1802_v43 = vpack.c.bf16 %v1018_v42, %v1016_v41  ;;  %1811 = vmatprep.subr.bf16.mxu1 %v1810_v22  ;;  %v1160_v41 = vld [vmem:[%s2767_s6 + $0xc0] sm:$0xff]  ;;  %v1161_v42 = vld [vmem:[%s2767_s6 + $0xc8] sm:$0xff] }
 0x1b9   : > { %920 = vmatprep.mubr.f32.mxu1 %v773_v58  ;;  %1801 = vmatpush1.bf16.msra.mxu0 %v1800_v40  ;;  %v1820_v40 = vpack.c.bf16 %v1143_v39, %v1142_v38 }
 0x1ba   : > { %921 = vmatmul.mubr.f32.gmra.mrb[2].mxu1 %v772_v59  ;;  %1803 = vmatprep.subr.bf16.mxu0 %v1802_v43  ;;  %v1822_v43 = vpack.c.bf16 %v1161_v42, %v1160_v41 }
 0x1bb   : > { %1813 = vmatpush3.bf16.msra.mxu1 %v1812_v26 }
 0x1bc   : > { %1815 = vmatprep.subr.bf16.mxu1 %v1814_v31 }
 0x1bd   : > { %1805 = vmatpush1.bf16.msra.mxu0 %v1804_v46  ;;  %v1824_v46 = vpack.c.bf16 %v1145_v45, %v1144_v44 }
 0x1bf   : > { %1817 = vmatpush3.bf16.msra.mxu1 %v1816_v34  ;;  %v1622_v34 = vld [vmem:[%s642_s24] ss:$0 sm:$0xff] }
 0x1c0   : > { %1819 = vmatprep.subr.bf16.mxu1 %v1818_v37  ;;  %v1623_v37 = vld [vmem:[%s2943_s22] ss:$0 sm:$0xff] }
 0x1c3   : > { %1821 = vmatpush3.bf16.msra.mxu1 %v1820_v40 }
 0x1c4   : > { %1823 = vmatprep.subr.bf16.mxu1 %v1822_v43 }
 0x1c7   : > { %1825 = vmatpush3.bf16.msra.mxu1 %v1824_v46 }
 0x289   : > { %v916_v50 = vpop.f32.mrb[0].mxu1 }
 0x28a   : > { %v917_v51 = vadd.f32 %v916_v50, %v843_v48  ;;  %v918_v52 = vpop.f32.mrb[1].mxu1  ;;  %v1146_v50 = vld [vmem:[%s2767_s6 + $0x50] sm:$0xff] }
 0x28b   : > { %v919_v53 = vadd.f32 %v918_v52, %v847_v49 }
 0x28c   : > { %v1614_v54 = vmul.f32 -1.442695, %v917_v51 }
 0x28d   : > { %v1615_v55 = vmul.f32 -1.442695, %v919_v53  ;;  %v922_v56 = vpop.f32.mrb[2].mxu1 }
 0x28e   : > { %1943 = vpow2.f32 %v1614_v54  ;;  %v923_v57 = vadd.f32 %v922_v56, %v843_v48  ;;  %v924_v58 = vpop.f32.mrb[3].mxu1  ;;  %v1163_v48 = vld [vmem:[%s2767_s6 + $0xd8] sm:$0xff]  ;;  %v1165_v54 = vld [vmem:[%s2767_s6 + $0xe8] sm:$0xff]  ;;  %v1148_v56 = vld [vmem:[%s2767_s6 + $0x60] sm:$0xff] }
 0x28f   : > { %1945 = vpow2.f32 %v1615_v55  ;;  %v925_v59 = vadd.f32 %v924_v58, %v847_v49  ;;  %v1826_v49 = vpack.c.bf16 %v1163_v48, %v1162_v47 }
 0x290   : > { %v1616_v60 = vmul.f32 -1.442695, %v923_v57 }
 0x291   : > { %v1617_v61 = vmul.f32 -1.442695, %v925_v59  ;;  %1827 = vmatprep.subr.bf16.mxu1 %v1826_v49 }
 0x292   : > { %1947 = vpow2.f32 %v1616_v60  ;;  %v1167_v60 = vld [vmem:[%s2767_s6 + $0xf8] sm:$0xff] }
 0x293   : > { %1949 = vpow2.f32 %v1617_v61 }
 0x298   : > { %v1944_v62 = vpop.eup %1943 }
 0x299   : > { %v1946_v63 = vpop.eup %1945  ;;  %v939_v0 = vadd.f32 1.0, %v1944_v62  ;;  %v1150_v62 = vld [vmem:[%s2767_s6 + $0x70] sm:$0xff] }
 0x29a   : > { %v940_v1 = vadd.f32 1.0, %v1946_v63  ;;  %v1151_v63 = vld [vmem:[%s2767_s6 + $0x78] sm:$0xff] }
 0x29b   : > { %1951 = vrcp.f32 %v939_v0  ;;  %v1836_v0 = vpack.c.bf16 %v1151_v63, %v1150_v62 }
 0x29c   : > { %v1948_v2 = vpop.eup %1947  ;;  %1953 = vrcp.f32 %v940_v1  ;;  %v1019_v1 = vld [vmem:[%s639_s25] sm:$0x3] }
 0x29d   : > { %v1950_v3 = vpop.eup %1949  ;;  %v941_v4 = vadd.f32 1.0, %v1948_v2  ;;  %v1024_v2 = vrot.slane %v1019_v1, %v2722_v27 }
 0x29e   : > { %v942_v5 = vadd.f32 1.0, %v1950_v3  ;;  %v1028_v3 = vrot.slane %v1019_v1, %v2724_v29 }
 0x29f   : > { %1955 = vrcp.f32 %v941_v4 }
 0x2a0   : > { %1957 = vrcp.f32 %v942_v5 }
 0x2a5   : > { %v1952_v6 = vpop.eup %1951 }
 0x2a6   : > { %v1954_v7 = vpop.eup %1953  ;;  %v951_v9 = vmul.f32 %v1952_v6, %v917_v51  ;;  %v1147_v51 = vld [vmem:[%s2767_s6 + $0x58] sm:$0xff] }
 0x2a7   : > { %v952_v8 = vmul.f32 %v1954_v7, %v919_v53  ;;  %v1828_v52 = vpack.c.bf16 %v1147_v51, %v1146_v50  ;;  %v1164_v53 = vld [vmem:[%s2767_s6 + $0xe0] sm:$0xff] }
 0x2a8   : > { %v1830_v55 = vpack.c.bf16 %v1165_v54, %v1164_v53 }
 0x2a9   : > { %v1956_v10 = vpop.eup %1955  ;;  %1095 = vmatprep.mubr.f32.mxu0 %v952_v8  ;;  %1829 = vmatpush3.bf16.msra.mxu1 %v1828_v52 }
 0x2aa   : > { %v1958_v11 = vpop.eup %1957  ;;  %1096 = vmatmul.mubr.f32.vlgmr.msra.gmra.mrb[4].mxu0 %v951_v9  ;;  %v953_v13 = vmul.f32 %v1956_v10, %v923_v57  ;;  %v1149_v57 = vld [vmem:[%s2767_s6 + $0x68] sm:$0xff]  ;;  %1831 = vmatprep.subr.bf16.mxu1 %v1830_v55 }
 0x2ab   : > { %v954_v12 = vmul.f32 %v1958_v11, %v925_v59  ;;  %v1832_v58 = vpack.c.bf16 %v1149_v57, %v1148_v56  ;;  %v1166_v59 = vld [vmem:[%s2767_s6 + $0xf0] sm:$0xff]  ;;  %s2833_s6 = scalar_lea.hbm %s2946_s14, %s1635_s8 }
 0x2ac   : > { %v1834_v61 = vpack.c.bf16 %v1167_v60, %v1166_v59 }
 0x2ad   : > { %1101 = vmatprep.mubr.f32.mxu0 %v954_v12  ;;  %1833 = vmatpush3.bf16.msra.mxu1 %v1832_v58 }
 0x2ae   : > { %1102 = vmatmul.mubr.f32.gmra.mrb[6].mxu0 %v953_v13  ;;  %1835 = vmatprep.subr.bf16.mxu1 %v1834_v61 }
 0x2b1   : > { %1837 = vmatpush3.bf16.msra.mxu1 %v1836_v0 }
 0x37d   : > { %v1097_v4 = vpop.f32.mrb[4].mxu0 }
 0x37e   : > { %v1098_v5 = vadd.f32 %v1097_v4, %v1024_v2  ;;  %v1099_v6 = vpop.f32.mrb[5].mxu0  ;;  %v1624_v4 = vld [vmem:[%s2944_s15] ss:$0 sm:$0xff] }
 0x37f   : > { %v1100_v7 = vadd.f32 %v1099_v6, %v1028_v3 }
 0x380   : > { %v1618_v8 = vmul.f32 -1.442695, %v1098_v5 }
 0x381   : > { %v1619_v9 = vmul.f32 -1.442695, %v1100_v7  ;;  %v1103_v10 = vpop.f32.mrb[6].mxu0 }
 0x382   : > { %1959 = vpow2.f32 %v1618_v8  ;;  %v1104_v11 = vadd.f32 %v1103_v10, %v1024_v2  ;;  %v1105_v12 = vpop.f32.mrb[7].mxu0 }
 0x383   : > { %1961 = vpow2.f32 %v1619_v9  ;;  %v1106_v13 = vadd.f32 %v1105_v12, %v1028_v3 }
 0x384   : > { %v1620_v14 = vmul.f32 -1.442695, %v1104_v11 }
 0x385   : > { %v1621_v15 = vmul.f32 -1.442695, %v1106_v13 }
 0x386   : > { %1963 = vpow2.f32 %v1620_v14 }
 0x387   : > { %1965 = vpow2.f32 %v1621_v15 }
 0x38c   : > { %v1960_v16 = vpop.eup %1959 }
 0x38d   : > { %v1962_v27 = vpop.eup %1961  ;;  %v1120_v17 = vadd.f32 1.0, %v1960_v16 }
 0x38e   : > { %v1121_v29 = vadd.f32 1.0, %v1962_v27 }
 0x38f   : > { %1967 = vrcp.f32 %v1120_v17 }
 0x390   : > { %v1964_v18 = vpop.eup %1963  ;;  %1969 = vrcp.f32 %v1121_v29 }
 0x391   : > { %v1966_v19 = vpop.eup %1965  ;;  %v1122_v20 = vadd.f32 1.0, %v1964_v18 }
 0x392   : > { %v1123_v21 = vadd.f32 1.0, %v1966_v19 }
 0x393   : > { %1971 = vrcp.f32 %v1122_v20 }
 0x394   : > { %1973 = vrcp.f32 %v1123_v21 }
 0x399   : > { %v1968_v22 = vpop.eup %1967 }
 0x39a   : > { %v1970_v23 = vpop.eup %1969  ;;  %v1132_v26 = vmul.f32 %v1968_v22, %v1098_v5 }
 0x39b   : > { %v1133_v24 = vmul.f32 %v1970_v23, %v1100_v7 }
 0x39d   : > { %v1972_v28 = vpop.eup %1971  ;;  %1239 = vmatprep.mubr.f32.mxu1 %v1133_v24 }
 0x39e   : > { %v1974_v30 = vpop.eup %1973  ;;  %1240 = vmatmul.mubr.f32.vlgmr.msra.gmra.mrb[4].mxu1 %v1132_v26  ;;  %v1134_v32 = vmul.f32 %v1972_v28, %v1104_v11 }
 0x39f   : > { %v1135_v31 = vmul.f32 %v1974_v30, %v1106_v13 }
 0x3a1   : > { %1244 = vmatprep.mubr.f32.mxu1 %v1135_v31 }
 0x3a2   : > { %1245 = vmatmul.mubr.f32.gmra.mrb[6].mxu1 %v1134_v32 }
 0x471   : > { %v1668_v33 = vpop.f32.mrb[4].mxu1 }
 0x472   : > { %v1669_v35 = vpop.f32.mrb[5].mxu1 }
 0x473   : > { %v1670_v36 = vadd.f32 %v1669_v35, %v1668_v33 }
 0x475   : > { %v2814_v38 = vadd.f32 %v1670_v36, %v1622_v34  ;;  %v1671_v39 = vpop.f32.mrb[6].mxu1 }
 0x476   : > { %v1672_v40 = vpop.f32.mrb[7].mxu1 }
 0x477   : > { %v1258_v41 = vsub.f32 %v1623_v37, %v2814_v38  ;;  %v1673_v42 = vadd.f32 %v1672_v40, %v1671_v39 }
 0x479   : > { %v1262_v43 = vand.u32 2147483647, %v1258_v41  ;;  %v2817_v44 = vadd.f32 %v1673_v42, %v1622_v34  ;;  %v1260_v63 = vmax.f32 %v1258_v41, 0.0 }
 0x47b   : > { %v1264_v45 = vsub.f32 0.0, %v1262_v43  ;;  %v1259_v46 = vsub.f32 %v1623_v37, %v2817_v44 }
 0x47d   : > { %v1266_v47 = vmul.f32 1.442695, %v1264_v45  ;;  %v1263_v48 = vand.u32 2147483647, %v1259_v46  ;;  %v1261_v8 = vmax.f32 %v1259_v46, 0.0 }
 0x47f   : > { %1975 = vpow2.f32 %v1266_v47  ;;  %v1265_v49 = vsub.f32 0.0, %v1263_v48  ;;  %v1337_v48 = vand.u32 127, %v652_v25 }
 0x481   : > { %v1268_v50 = vmul.f32 1.442695, %v1265_v49  ;;  %vm1338_vm5 = vcmp.ge.s32.totalorder %v1337_v48, 4  ;;  %vm1339_vm6 = vcmp.lt.s32.totalorder %v1337_v48, 8 }
 0x482   : > { %vm1340_vm7 = vmand %vm1338_vm5, %vm1339_vm6 }
 0x483   : > { %1977 = vpow2.f32 %v1268_v50 }
 0x489   : > { %v1976_v51 = vpop.eup %1975 }
 0x48a   : > { %v1270_v52 = vadd.f32 1.0, %v1976_v51  ;;  %v1273_v55 = vmul.f32 -0.5, %v1976_v51  ;;  %v1276_v58 = vand.u32 2147483647, %v1976_v51 }
 0x48c   : > { %1979 = vlog2.f32 %v1270_v52  ;;  %v1274_v56 = vadd.f32 1.0, %v1273_v55  ;;  %vm1277_vm1 = vcmp.lt.f32.partialorder %v1276_v58, 0.0004427343 }
 0x48d   : > { %v1978_v53 = vpop.eup %1977 }
 0x48e   : > { %v1279_v54 = vadd.f32 1.0, %v1978_v53  ;;  %v1282_v57 = vmul.f32 -0.5, %v1978_v53  ;;  %v1275_v61 = vmul.f32 %v1976_v51, %v1274_v56  ;;  %v1285_v0 = vand.u32 2147483647, %v1978_v53 }
 0x490   : > { %1981 = vlog2.f32 %v1279_v54  ;;  %v1283_v62 = vadd.f32 1.0, %v1282_v57  ;;  %vm1286_vm2 = vcmp.lt.f32.partialorder %v1285_v0, 0.0004427343 }
 0x492   : > { %v1284_v6 = vmul.f32 %v1978_v53, %v1283_v62 }
 0x496   : > { %v1980_v59 = vpop.eup %1979 }
 0x497   : > { %v1272_v60 = vmul.f32 0.6931472, %v1980_v59 }
 0x499   : > { %v1278_v1 = vsel %vm1277_vm1, %v1275_v61, %v1272_v60 }
 0x49a   : > { %v1982_v2 = vpop.eup %1981  ;;  %v1288_v3 = vadd.f32 %v1278_v1, %v1260_v63 }
 0x49b   : > { %v1281_v5 = vmul.f32 0.6931472, %v1982_v2 }
 0x49c   : > { %v1290_v7 = vsub.f32 %v1623_v37, %v1288_v3 }
 0x49d   : > { %v1287_v9 = vsel %vm1286_vm2, %v1284_v6, %v1281_v5 }
 0x49e   : > { %v1298_v10 = vsub.f32 %v1290_v7, %v1624_v4  ;;  %v1289_v11 = vadd.f32 %v1287_v9, %v1261_v8 }
 0x4a0   : > { %v1302_v12 = vand.u32 2147483647, %v1298_v10  ;;  %v1291_v13 = vsub.f32 %v1623_v37, %v1289_v11  ;;  %v1300_v33 = vmax.f32 %v1298_v10, 0.0 }
 0x4a2   : > { %v1304_v14 = vsub.f32 0.0, %v1302_v12  ;;  %v1299_v15 = vsub.f32 %v1291_v13, %v1624_v4 }
 0x4a4   : > { %v1306_v16 = vmul.f32 1.442695, %v1304_v14  ;;  %v1303_v27 = vand.u32 2147483647, %v1299_v15  ;;  %v1301_v42 = vmax.f32 %v1299_v15, 0.0 }
 0x4a6   : > { %1983 = vpow2.f32 %v1306_v16  ;;  %v1305_v17 = vsub.f32 0.0, %v1303_v27 }
 0x4a8   : > { %v1308_v29 = vmul.f32 1.442695, %v1305_v17 }
 0x4aa   : > { %1985 = vpow2.f32 %v1308_v29 }
 0x4b0   : > { %v1984_v18 = vpop.eup %1983 }
 0x4b1   : > { %v1310_v19 = vadd.f32 1.0, %v1984_v18  ;;  %v1313_v22 = vmul.f32 -0.5, %v1984_v18  ;;  %v1316_v26 = vand.u32 2147483647, %v1984_v18 }
 0x4b3   : > { %1987 = vlog2.f32 %v1310_v19  ;;  %v1314_v23 = vadd.f32 1.0, %v1313_v22  ;;  %vm1317_vm3 = vcmp.lt.f32.partialorder %v1316_v26, 0.0004427343 }
 0x4b4   : > { %v1986_v20 = vpop.eup %1985 }
 0x4b5   : > { %v1319_v21 = vadd.f32 1.0, %v1986_v20  ;;  %v1322_v24 = vmul.f32 -0.5, %v1986_v20  ;;  %v1315_v31 = vmul.f32 %v1984_v18, %v1314_v23  ;;  %v1325_v34 = vand.u32 2147483647, %v1986_v20 }
 0x4b7   : > { %1989 = vlog2.f32 %v1319_v21  ;;  %v1323_v32 = vadd.f32 1.0, %v1322_v24  ;;  %vm1326_vm4 = vcmp.lt.f32.partialorder %v1325_v34, 0.0004427343 }
 0x4b9   : > { %v1324_v40 = vmul.f32 %v1986_v20, %v1323_v32 }
 0x4bd   : > { %v1988_v28 = vpop.eup %1987 }
 0x4be   : > { %v1312_v30 = vmul.f32 0.6931472, %v1988_v28 }
 0x4c0   : > { %v1318_v35 = vsel %vm1317_vm3, %v1315_v31, %v1312_v30 }
 0x4c1   : > { %v1990_v36 = vpop.eup %1989  ;;  %v1328_v37 = vadd.f32 %v1318_v35, %v1300_v33 }
 0x4c2   : > { %v1321_v39 = vmul.f32 0.6931472, %v1990_v36 }
 0x4c3   : > { %v1330_v41 = vadd.f32 %v1624_v4, %v1328_v37 }
 0x4c4   : > { %v1327_v43 = vsel %vm1326_vm4, %v1324_v40, %v1321_v39 }
 0x4c5   : > { %v1332_v45 = vmul.f32 1.442695, %v1330_v41  ;;  %v1329_v46 = vadd.f32 %v1327_v43, %v1301_v42 }
 0x4c7   : > { %1991 = vpow2.f32 %v1332_v45  ;;  %v1331_v47 = vadd.f32 %v1624_v4, %v1329_v46 }
 0x4c9   : > { %v1334_v49 = vmul.f32 1.442695, %v1331_v47 }
 0x4cb   : > { %1993 = vpow2.f32 %v1334_v49 }
 0x4d1   : > { %v1992_v50 = vpop.eup %1991 }
 0x4d2   : > { %v1341_v51 = vsel %vm1340_vm7, %v1992_v50, %v2814_v38 }
 0x4d3   : > { %1343 = vst [vmem:[%s626_s10] sm:$0xff] %v1341_v51 }
 0x4d5   : > { %v1994_v25 = vpop.eup %1993 }
 0x4d6   : > { %v1342_v52 = vsel %vm1340_vm7, %v1994_v25, %v2817_v44 }
 0x4d7   : > { %1344 = vst [vmem:[%s626_s10 + $0x8] sm:$0xff] %v1342_v52 }
 0x4d8   : > { %2158 = shalt.err (!%p2155_p12)
}
 0x4d9   : > { %s2159_s25 = scalar_lea.hbm %s2833_s6, 256  ;;  %s2163_s26 = scalar_lea.hbm %s2946_s14, 512 }
 0x4da   : > { %p2160_p4 = scmp.ne.s32.totalorder %s2833_s6, %s2159_s25  ;;  %p2164_p2 = scmp.lt.u32.totalorder %s2833_s6, %s2946_s14 }
 0x4db   : > { %p2165_p10 = scmp.lt.u32.totalorder %s2163_s26, %s2159_s25  ;;  %p2167_p7 = scmp.lt.u32.totalorder %s2159_s25, %s2833_s6 }
 0x4dc   : > { %p2161_p13 = pnand %p2160_p4, %p2947_p3 }
 0x4dd   : > { %p2166_p0 = por %p2165_p10, %p2164_p2 }
 0x4de   : > { %p2162_p9 = pneg %p2161_p13 }
 0x4df   : > { %p2168_p5 = por %p2167_p7, %p2166_p0 }
 0x4e1   : > { %p2169_p1 = pnand %p2168_p5, %p2162_p9 }
 0x4e3   : > { %2172 = shalt.err (!%p2169_p1)
}
 0x4e4   : > { %s2248_s13 = smov 128   ;;  %s2249_s22 = smov 8  }
 0x4e5   : > { %1848 = dma.vmem_to_hbm [thread:$0]  (%p2947_p3), %s2828_s27, 256, %s2833_s6, %s1346_s12, %s2248_s13, %s2248_s13, %s2249_s22  }
 0x4e6 PF: > { %s2948_s23 = sld [smem:[#allocation16_spill]]  ;;  %s2949_s29 = sld [smem:[#allocation22_spill]] }
 0x4e7   : > { %s2950_s15 = sld [smem:[#allocation18_spill]] }
 0x4ec   : > { %s1376_s10 = sand.u32 1, %s2948_s23   ;;  %p2951_p6 = scmp.ne.s32.totalorder %s2949_s29, 0 }
 0x4ed   : > { %p2952_p8 = scmp.ge.s32.totalorder %s2950_s15, 2  ;;  %s1377_s8 = scalar_lea.sflag [#allocation4], %s1376_s10 }
 0x4ef   : > { %p1867_p11 = pnand %p2952_p8, %p2951_p6 }
 0x4f1   : > { %2210 = dma.done.wait (!%p1867_p11), %s1377_s8, 256  }
 0x4f2   : > { %2212 = vsyncadd (!%p1867_p11), %s1377_s8, 4294967040  ;;  %s33_s22 = sadd.s32 1, %s2950_s15   ;;  %s2953_s30 = sld [smem:[#allocation17_spill]] }
 0x4f3   : > { %p30_p12 = scmp.ge.s32.totalorder %s33_s22, 4   ;;  %s2954_s19 = sld [smem:[#allocation21_spill]] }
 0x4f4   : > { %s2955_s11 = sld [smem:[#allocation19_spill]]  ;;  %s2956_s17 = smov %s2219_s18 }
 0x4f5   : > { %s2958_s20 = smov %s2231_s21  ;;  %32 = sbr.rel (!%p30_p12) target bundleno = 19 (0x13), region = 169 }
 0x4f8   : > { %s2957_s18 = smov %s2953_s30 }
 0x4fa   : > { %s2959_s21 = smov %s2955_s11 }
 0x4fc   :  { %1382 = vsyncpa [#allocation3], 1 }
 0x4fd   :  { %1384 = vsyncpa [#allocation3 + $0x1], 1 }
 0x4fe   :  { %1385 = vsyncpa [#allocation6], 1 }
 0x4ff   :  { %1387 = vsyncpa [#allocation6 + $0x1], 1 }
 0x500   :  { %1388 = vsyncpa [#allocation9], 1 }
 0x501   :  { %1390 = vsyncpa [#allocation9 + $0x1], 1 }
 0x502   :  { %1391 = vsyncpa [#allocation4], 1 }
 0x503   :  { %1393 = vsyncpa [#allocation4 + $0x1], 1 }

</bundles_post_ra>
